<compile_context>
chip_gen: v5e
topology: v5e:2x2
jax: 0.10.0
libtpu: 0.0.40
codegen_flags: <defaults>
</compile_context>

<pallas_src>
import functools

import jax
import jax.numpy as jnp
from jax.experimental import pallas as pl
from jax.experimental.pallas import tpu as pltpu


CFG = dict(
    dim=64,
    n_heads=4,
    head_dim=16,
    ffn_dim=128,
    n_layers=2,
    rope_theta=10000.0,
    text_vocab=48,
    speech_vocab=80,
    max_text_tokens=16,
    max_speech_tokens=16,
    spk_dim=32,
    start_text_token=1,
    stop_text_token=2,
    rms_eps=1e-6,
)


# ----------------------------------------------------------------------------
# Fused Llama backbone kernel: grid = (batch, layer)
# ----------------------------------------------------------------------------
def _backbone_kernel(embeds_ref, cos_ref, sin_ref,
                     ln1_ref, ln2_ref, wproj_ref, wo_ref, wgu_ref, wd_ref,
                     fnorm_ref, out_ref, h_ref,
                     *, H, Dh, D, F, eps):
    layer = pl.program_id(1)

    @pl.when(layer == 0)
    def _():
        h_ref[...] = embeds_ref[...].astype(jnp.float32)

    def rmsnorm(x, w):
        var = jnp.mean(x * x, axis=-1, keepdims=True)
        return x * jax.lax.rsqrt(var + eps) * w

    h = h_ref[...]
    Tp = h.shape[0]

    # ---- attention block ----------------------------------------------------
    xn = rmsnorm(h, ln1_ref[0])                                           # (Tp, D)
    # Fused projection: [ q | k | v | rotate_half(q) | rotate_half(k) ]
    proj = jnp.dot(xn, wproj_ref[0], preferred_element_type=jnp.float32)  # (Tp, 5D)
    cos = cos_ref[...]
    sin = sin_ref[...]
    q = proj[:, 0 * D:1 * D] * cos + proj[:, 3 * D:4 * D] * sin           # RoPE(q)
    k = proj[:, 1 * D:2 * D] * cos + proj[:, 4 * D:5 * D] * sin           # RoPE(k)
    v = proj[:, 2 * D:3 * D]

    scale = 1.0 / (Dh ** 0.5)
    # Additive causal bias, computed once per layer (not per head).  Valid rows
    # never see pad columns because col <= row < T for real positions.
    row = jax.lax.broadcasted_iota(jnp.int32, (Tp, Tp), 0)
    col = jax.lax.broadcasted_iota(jnp.int32, (Tp, Tp), 1)
    bias = jnp.where(col <= row, 0.0, -1e30).astype(jnp.float32)

    # Per-head attention; outputs stay in registers and are concatenated once
    # (no masked 16-lane stores into a VMEM scratch).
    head_outs = []
    for hd in range(H):
        c0 = hd * Dh
        q_h = q[:, c0:c0 + Dh]
        k_h = k[:, c0:c0 + Dh]
        v_h = v[:, c0:c0 + Dh]
        s = jax.lax.dot_general(
            q_h, k_h, (((1,), (1,)), ((), ())),
            preferred_element_type=jnp.float32) * scale + bias            # (Tp, Tp)
        s = s - jnp.max(s, axis=-1, keepdims=True)
        p = jnp.exp(s)
        p = p / jnp.sum(p, axis=-1, keepdims=True)                        # exact div
        head_outs.append(jnp.dot(p, v_h, preferred_element_type=jnp.float32))
    attn = jnp.concatenate(head_outs, axis=-1)                            # (Tp, D)

    h = h + jnp.dot(attn, wo_ref[0], preferred_element_type=jnp.float32)

    # ---- MLP block (SwiGLU, gate|up fused to a single 2F-wide matmul) -------
    xn2 = rmsnorm(h, ln2_ref[0])
    gu = jnp.dot(xn2, wgu_ref[0], preferred_element_type=jnp.float32)     # (Tp, 2F)
    g = gu[:, :F]
    u = gu[:, F:]
    a = (g * jax.nn.sigmoid(g)) * u
    h = h + jnp.dot(a, wd_ref[0], preferred_element_type=jnp.float32)

    h_ref[...] = h

    @pl.when(layer == pl.num_programs(1) - 1)
    def _():
        # Output block index is constant across the layer axis; only this final
        # write matters (writeback happens when the batch block index changes).
        out_ref[...] = rmsnorm(h, fnorm_ref[...]).astype(out_ref.dtype)


def pallas_llama_backbone(embeds_flat, cos, sin, ln1, ln2, wproj, wo, wgu, wd,
                          final_norm, *, B, Tp, cfg):
    D, H, Dh, F = cfg["dim"], cfg["n_heads"], cfg["head_dim"], cfg["ffn_dim"]
    L = cfg["n_layers"]
    kernel = functools.partial(
        _backbone_kernel, H=H, Dh=Dh, D=D, F=F, eps=cfg["rms_eps"])

    def shared2(shape):
        return pl.BlockSpec(shape, lambda b, l: (0, 0))

    def per_layer(shape):
        return pl.BlockSpec((1,) + shape, lambda b, l: (l, 0, 0))

    return pl.pallas_call(
        kernel,
        out_shape=jax.ShapeDtypeStruct((B * Tp, D), jnp.float32),
        grid=(B, L),
        in_specs=[
            pl.BlockSpec((Tp, D), lambda b, l: (b, 0)),   # embeds (per-batch row block)
            shared2((Tp, D)),                             # cos (shared)
            shared2((Tp, D)),                             # sin (shared)
            per_layer((1, D)),                            # ln1    (L, 1, D)
            per_layer((1, D)),                            # ln2    (L, 1, D)
            per_layer((D, 5 * D)),                        # wproj  (L, D, 5D)
            per_layer((D, D)),                            # wo     (L, D, D)
            per_layer((D, 2 * F)),                        # wgu    (L, D, 2F)
            per_layer((F, D)),                            # wd     (L, F, D)
            shared2((1, D)),                              # final norm
        ],
        out_specs=pl.BlockSpec((Tp, D), lambda b, l: (b, 0)),
        scratch_shapes=[pltpu.VMEM((Tp, D), jnp.float32)],   # hidden state
        compiler_params=pltpu.CompilerParams(
            dimension_semantics=("parallel", "arbitrary")),
    )(embeds_flat, cos, sin, ln1, ln2, wproj, wo, wgu, wd, final_norm)


# ----------------------------------------------------------------------------
# Fused LM heads: one lane-dense matmul for text|speech logits
# ----------------------------------------------------------------------------
def _heads_kernel(x_ref, w_ref, o_ref):
    o_ref[...] = jnp.dot(x_ref[...], w_ref[...], preferred_element_type=jnp.float32)


def pallas_heads(latents, w_fused):
    M, D = latents.shape
    V = w_fused.shape[1]

    def b2(shape):
        return pl.BlockSpec(shape, lambda i: (0, 0))

    return pl.pallas_call(
        _heads_kernel,
        out_shape=jax.ShapeDtypeStruct((M, V), jnp.float32),
        grid=(1,),
        in_specs=[b2((M, D)), b2((D, V))],
        out_specs=b2((M, V)),
    )(latents, w_fused)


# ----------------------------------------------------------------------------
# Model glue (plain JAX)
# ----------------------------------------------------------------------------
def _ensure_BOT_EOT(text_tokens, cfg):
    B = text_tokens.shape[0]
    assert int(jnp.sum(text_tokens == cfg["start_text_token"])) >= B, "missing start_text_token"
    assert int(jnp.sum(text_tokens == cfg["stop_text_token"])) >= B, "missing stop_text_token"


def init_params(key, cfg):
    D, F = cfg["dim"], cfg["ffn_dim"]
    H, Dh = cfg["n_heads"], cfg["head_dim"]
    L = cfg["n_layers"]
    keys = iter(jax.random.split(key, 128))

    def w(shape, scale=0.02):
        return (scale * jax.random.normal(next(keys), shape)).astype(jnp.float32)

    def rot_cols(wmat):
        # Column permutation + negation implementing rotate_half on the output:
        # (x @ rot_cols(W)) == rotate_half(x @ W), per head block.
        w3 = wmat.reshape(D, H, Dh)
        w1, w2 = w3[..., :Dh // 2], w3[..., Dh // 2:]
        return jnp.concatenate([-w2, w1], axis=-1).reshape(D, H * Dh)

    ln1, ln2, wproj, wo, wgu, wd = [], [], [], [], [], []
    for _ in range(L):
        wq, wk, wv = w((D, D)), w((D, D)), w((D, D))
        ln1.append(jnp.ones((1, D), jnp.float32))
        ln2.append(jnp.ones((1, D), jnp.float32))
        wproj.append(jnp.concatenate(
            [wq, wk, wv, rot_cols(wq), rot_cols(wk)], axis=1))        # (D, 5D)
        wo.append(w((D, D)))
        wgu.append(jnp.concatenate([w((D, F)), w((D, F))], axis=1))   # gate | up
        wd.append(w((F, D)))

    # Heads stored pre-transposed and pre-fused: (D, Vt + Vs) == (D, 128) lanes.
    text_head = w((D, cfg["text_vocab"]))
    speech_head = w((D, cfg["speech_vocab"]))

    return dict(
        text_emb=w((cfg["text_vocab"], D)),
        speech_emb=w((cfg["speech_vocab"], D)),
        text_pos=w((cfg["max_text_tokens"] + 2, D)),
        speech_pos=w((cfg["max_speech_tokens"] + 2 + 2, D)),
        cond_proj=w((cfg["spk_dim"], D)),
        ln1=jnp.stack(ln1), ln2=jnp.stack(ln2),
        wproj=jnp.stack(wproj), wo=jnp.stack(wo),
        wgu=jnp.stack(wgu), wd=jnp.stack(wd),
        final_norm=jnp.ones((1, D), jnp.float32),
        head_fused=jnp.concatenate([text_head, speech_head], axis=1),   # (D, 128)
    )


def _rope_tables(Tp, H, Dh, theta):
    inv_freq = 1.0 / (theta ** (jnp.arange(0, Dh, 2, dtype=jnp.float32) / Dh))
    t = jnp.arange(Tp, dtype=jnp.float32)
    freqs = jnp.outer(t, inv_freq)                       # (Tp, Dh/2)
    emb = jnp.concatenate([freqs, freqs], axis=-1)       # (Tp, Dh)
    cos = jnp.tile(jnp.cos(emb), (1, H))                 # (Tp, D), per-head tiled
    sin = jnp.tile(jnp.sin(emb), (1, H))
    return cos, sin


def t3_forward(params, speaker_emb, text_tokens, text_token_lens,
               speech_tokens, speech_token_lens, cfg):
    B, Lt = text_tokens.shape
    _, Ls = speech_tokens.shape
    D = cfg["dim"]
    H, Dh = cfg["n_heads"], cfg["head_dim"]

    # TODO(synk): T3CondEnc is not in the reference source; conditioning is
    # simplified to a single linear projection of the speaker embedding.
    cond_emb = jnp.dot(speaker_emb, params["cond_proj"]).reshape(B, 1, D)
    len_cond = 1

    text_emb = jnp.take(params["text_emb"], text_tokens, axis=0) \
        + params["text_pos"][:Lt][None]
    speech_emb = jnp.take(params["speech_emb"], speech_tokens, axis=0) \
        + params["speech_pos"][:Ls][None]

    embeds = jnp.concatenate([cond_emb, text_emb, speech_emb], axis=1)   # (B, T, D)
    T = 1 + Lt + Ls
    Tp = ((T + 7) // 8) * 8           # sublane-align the sequence length
    embeds = jnp.pad(embeds, ((0, 0), (0, Tp - T), (0, 0)))

    cos, sin = _rope_tables(Tp, H, Dh, cfg["rope_theta"])                # (Tp, D)

    hidden_flat = pallas_llama_backbone(
        embeds.reshape(B * Tp, D), cos, sin,
        params["ln1"], params["ln2"], params["wproj"], params["wo"],
        params["wgu"], params["wd"], params["final_norm"],
        B=B, Tp=Tp, cfg=cfg)
    hidden = hidden_flat.reshape(B, Tp, D)[:, :T]   # drop seq padding

    text_h = hidden[:, len_cond:len_cond + Lt]                    # (B, Lt, D)
    speech_h = hidden[:, len_cond + Lt:len_cond + Lt + Ls]        # (B, Ls, D)

    # Length masking in XLA (fuses into the slice); matches the reference,
    # which zero-fills latents beyond the per-example token lengths.
    tmask = (jnp.arange(Lt)[None, :] < text_token_lens[:, None]).astype(jnp.float32)
    smask = (jnp.arange(Ls)[None, :] < speech_token_lens[:, None]).astype(jnp.float32)
    text_latents = text_h * tmask[..., None]
    speech_latents = speech_h * smask[..., None]

    Mt, Ms = B * Lt, B * Ls
    lat = jnp.concatenate(
        [text_latents.reshape(Mt, D), speech_latents.reshape(Ms, D)], axis=0)
    logits = pallas_heads(lat, params["head_fused"])              # (Mt+Ms, Vt+Vs)
    Vt, Vs = cfg["text_vocab"], cfg["speech_vocab"]
    text_logits = logits[:Mt, :Vt].reshape(B, Lt, Vt)
    speech_logits = logits[Mt:, Vt:].reshape(B, Ls, Vs)

    return dict(
        text_logits=text_logits,
        text_latents=text_latents,
        speech_logits=speech_logits,
        speech_latents=speech_latents,
        hidden_states=hidden,
    )


# ----------------------------------------------------------------------------
if __name__ == "__main__":
    cfg = CFG
    key = jax.random.PRNGKey(0)
    k_par, k_spk = jax.random.split(key)

    params = init_params(k_par, cfg)

    B, Lt, Ls = 2, 8, 8
    # text tokens contain BOT(=1) and EOT(=2) per example, zero-padded past length
    text_tokens = jnp.array(
        [[1, 5, 6, 7, 8, 9, 10, 2],
         [1, 11, 12, 13, 2, 0, 0, 0]], dtype=jnp.int32)
    text_token_lens = jnp.array([8, 5], dtype=jnp.int32)
    speech_tokens = jnp.array(
        [[3, 4, 5, 6, 7, 8, 9, 10],
         [3, 4, 5, 6, 7, 8, 0, 0]], dtype=jnp.int32)
    speech_token_lens = jnp.array([8, 6], dtype=jnp.int32)
    speaker_emb = jax.random.normal(k_spk, (B, cfg["spk_dim"]), dtype=jnp.float32)

    # Host-side semantic check, kept OUT of the jitted forward path.
    _ensure_BOT_EOT(text_tokens, cfg)

    fwd = jax.jit(functools.partial(t3_forward, cfg=cfg))
    out = fwd(params, speaker_emb, text_tokens, text_token_lens,
              speech_tokens, speech_token_lens)

    jax.block_until_ready(out["text_logits"])
    jax.block_until_ready(out["speech_logits"])
    jax.block_until_ready(out["hidden_states"])

    assert out["text_logits"].shape == (B, Lt, cfg["text_vocab"])
    assert out["speech_logits"].shape == (B, Ls, cfg["speech_vocab"])
    assert out["hidden_states"].shape == (B, 1 + Lt + Ls, cfg["dim"])
    assert bool(jnp.all(jnp.isfinite(out["text_logits"])))
    assert bool(jnp.all(jnp.isfinite(out["speech_logits"])))
    print("KERNEL_OK")
</pallas_src>

<mosaic_0001>
module attributes {stable_mosaic.version = 11 : i64} {
  func.func @_backbone_kernel(%arg0: i32, %arg1: i32, %arg2: memref<24x64xf32, #tpu.memory_space<vmem>>, %arg3: memref<24x64xf32, #tpu.memory_space<vmem>>, %arg4: memref<24x64xf32, #tpu.memory_space<vmem>>, %arg5: memref<1x1x64xf32, #tpu.memory_space<vmem>>, %arg6: memref<1x1x64xf32, #tpu.memory_space<vmem>>, %arg7: memref<1x64x320xf32, #tpu.memory_space<vmem>>, %arg8: memref<1x64x64xf32, #tpu.memory_space<vmem>>, %arg9: memref<1x64x256xf32, #tpu.memory_space<vmem>>, %arg10: memref<1x128x64xf32, #tpu.memory_space<vmem>>, %arg11: memref<1x64xf32, #tpu.memory_space<vmem>>, %arg12: memref<24x64xf32, #tpu.memory_space<vmem>>, %arg13: memref<24x64xf32, #tpu.memory_space<vmem>>) attributes {dimension_semantics = [#tpu.dimension_semantics<parallel>, #tpu.dimension_semantics<arbitrary>], iteration_bounds = array<i64: 2, 2>, scalar_prefetch = 0 : i64, scratch_operands = 1 : i64, tpu.core_type = #tpu.core_type<tc>, window_params = [{transform_indices = @transform_0, window_bounds = array<i64: 24, 64>}, {pipeline_mode = #tpu.pipeline_mode<synchronous>, transform_indices = @transform_1, window_bounds = array<i64: 24, 64>}, {pipeline_mode = #tpu.pipeline_mode<synchronous>, transform_indices = @transform_2, window_bounds = array<i64: 24, 64>}, {transform_indices = @transform_3, window_bounds = array<i64: 1, 1, 64>}, {transform_indices = @transform_4, window_bounds = array<i64: 1, 1, 64>}, {transform_indices = @transform_5, window_bounds = array<i64: 1, 64, 320>}, {transform_indices = @transform_6, window_bounds = array<i64: 1, 64, 64>}, {transform_indices = @transform_7, window_bounds = array<i64: 1, 64, 256>}, {transform_indices = @transform_8, window_bounds = array<i64: 1, 128, 64>}, {pipeline_mode = #tpu.pipeline_mode<synchronous>, transform_indices = @transform_9, window_bounds = array<i64: 1, 64>}, {transform_indices = @transform_10, window_bounds = array<i64: 24, 64>}]} {
    %c0_i32 = arith.constant 0 : i32
    %0 = arith.cmpi eq, %arg1, %c0_i32 : i32
    %1 = arith.extui %0 : i1 to i32
    %c0_i32_0 = arith.constant 0 : i32
    %2 = arith.cmpi ne, %1, %c0_i32_0 : i32
    scf.if %2 {
      %c0_59 = arith.constant 0 : index
      %c0_60 = arith.constant 0 : index
      %147 = vector.load %arg2[%c0_59, %c0_60] : memref<24x64xf32, #tpu.memory_space<vmem>>, vector<24x64xf32>
      %c0_61 = arith.constant 0 : index
      %c0_62 = arith.constant 0 : index
      %148 = vector.load %arg13[%c0_61, %c0_62] : memref<24x64xf32, #tpu.memory_space<vmem>>, vector<24x64xf32>
      tpu.vector_store %arg13[%c0_61, %c0_62], %147 {strides = array<i32>} : memref<24x64xf32, #tpu.memory_space<vmem>>, vector<24x64xf32>,
    } else {
    }
    %c0 = arith.constant 0 : index
    %c0_1 = arith.constant 0 : index
    %3 = vector.load %arg13[%c0, %c0_1] : memref<24x64xf32, #tpu.memory_space<vmem>>, vector<24x64xf32>
    %c0_2 = arith.constant 0 : index
    %c0_3 = arith.constant 0 : index
    %c0_4 = arith.constant 0 : index
    %4 = vector.load %arg5[%c0_2, %c0_3, %c0_4] : memref<1x1x64xf32, #tpu.memory_space<vmem>>, vector<1x1x64xf32>
    %5 = vector.shape_cast %4 : vector<1x1x64xf32> to vector<1x64xf32>
    %6 = arith.mulf %3, %3 : vector<24x64xf32>
    %cst = arith.constant dense<0.000000e+00> : vector<24xf32>
    %7 = vector.multi_reduction <add>, %6, %cst [1] : vector<24x64xf32> to vector<24xf32>
    %8 = vector.shape_cast %7 : vector<24xf32> to vector<24x1xf32>
    %cst_5 = arith.constant 6.400000e+01 : f32
    %9 = vector.broadcast %cst_5 : f32 to vector<24x1xf32>
    %10 = arith.divf %8, %9 : vector<24x1xf32>
    %cst_6 = arith.constant 9.99999997E-7 : f32
    %11 = vector.broadcast %cst_6 : f32 to vector<24x1xf32>
    %12 = arith.addf %10, %11 : vector<24x1xf32>
    %13 = math.rsqrt %12 : vector<24x1xf32>
    %14 = vector.broadcast %13 : vector<24x1xf32> to vector<24x64xf32>
    %15 = arith.mulf %3, %14 : vector<24x64xf32>
    %16 = vector.broadcast %5 : vector<1x64xf32> to vector<24x64xf32>
    %17 = arith.mulf %15, %16 : vector<24x64xf32>
    %c0_7 = arith.constant 0 : index
    %c0_8 = arith.constant 0 : index
    %c0_9 = arith.constant 0 : index
    %18 = vector.load %arg7[%c0_7, %c0_8, %c0_9] : memref<1x64x320xf32, #tpu.memory_space<vmem>>, vector<1x64x320xf32>
    %19 = vector.shape_cast %18 : vector<1x64x320xf32> to vector<64x320xf32>
    %cst_10 = arith.constant dense<0.000000e+00> : vector<24x320xf32>
    %20 = tpu.matmul %17, %19, %cst_10 {dimension_numbers = #tpu.dot_dimension_numbers<[1], [0], [0], [1], [0, 0, 1, 1], [], []>} : vector<24x64xf32>, vector<64x320xf32>, vector<24x320xf32> -> vector<24x320xf32>
    %c0_11 = arith.constant 0 : index
    %c0_12 = arith.constant 0 : index
    %21 = vector.load %arg3[%c0_11, %c0_12] : memref<24x64xf32, #tpu.memory_space<vmem>>, vector<24x64xf32>
    %c0_13 = arith.constant 0 : index
    %c0_14 = arith.constant 0 : index
    %22 = vector.load %arg4[%c0_13, %c0_14] : memref<24x64xf32, #tpu.memory_space<vmem>>, vector<24x64xf32>
    %23 = vector.extract_strided_slice %20 {offsets = [0, 0], sizes = [24, 64], strides = [1, 1]} : vector<24x320xf32> to vector<24x64xf32>
    %24 = arith.mulf %23, %21 : vector<24x64xf32>
    %25 = vector.extract_strided_slice %20 {offsets = [0, 192], sizes = [24, 64], strides = [1, 1]} : vector<24x320xf32> to vector<24x64xf32>
    %26 = arith.mulf %25, %22 : vector<24x64xf32>
    %27 = arith.addf %24, %26 : vector<24x64xf32>
    %28 = vector.extract_strided_slice %20 {offsets = [0, 64], sizes = [24, 64], strides = [1, 1]} : vector<24x320xf32> to vector<24x64xf32>
    %29 = arith.mulf %28, %21 : vector<24x64xf32>
    %30 = vector.extract_strided_slice %20 {offsets = [0, 256], sizes = [24, 64], strides = [1, 1]} : vector<24x320xf32> to vector<24x64xf32>
    %31 = arith.mulf %30, %22 : vector<24x64xf32>
    %32 = arith.addf %29, %31 : vector<24x64xf32>
    %33 = vector.extract_strided_slice %20 {offsets = [0, 128], sizes = [24, 64], strides = [1, 1]} : vector<24x320xf32> to vector<24x64xf32>
    %34 = tpu.iota {dimensions = array<i32: 0>} : vector<24x24xi32>
    %35 = tpu.iota {dimensions = array<i32: 1>} : vector<24x24xi32>
    %36 = arith.cmpi sle, %35, %34 : vector<24x24xi32>
    %cst_15 = arith.constant 0.000000e+00 : f32
    %cst_16 = arith.constant -1.000000e+30 : f32
    %37 = vector.broadcast %cst_15 : f32 to vector<24x24xf32>
    %38 = vector.broadcast %cst_16 : f32 to vector<24x24xf32>
    %39 = arith.select %36, %37, %38 : vector<24x24xi1>, vector<24x24xf32>
    %40 = vector.extract_strided_slice %27 {offsets = [0, 0], sizes = [24, 16], strides = [1, 1]} : vector<24x64xf32> to vector<24x16xf32>
    %41 = vector.extract_strided_slice %32 {offsets = [0, 0], sizes = [24, 16], strides = [1, 1]} : vector<24x64xf32> to vector<24x16xf32>
    %42 = vector.extract_strided_slice %33 {offsets = [0, 0], sizes = [24, 16], strides = [1, 1]} : vector<24x64xf32> to vector<24x16xf32>
    %cst_17 = arith.constant dense<0.000000e+00> : vector<24x24xf32>
    %43 = tpu.matmul %40, %41, %cst_17 {dimension_numbers = #tpu.dot_dimension_numbers<[1], [1], [0], [0], [0, 0, 1, 0], [], []>} : vector<24x16xf32>, vector<24x16xf32>, vector<24x24xf32> -> vector<24x24xf32>
    %cst_18 = arith.constant 2.500000e-01 : f32
    %44 = vector.broadcast %cst_18 : f32 to vector<24x24xf32>
    %45 = arith.mulf %43, %44 : vector<24x24xf32>
    %46 = arith.addf %45, %39 : vector<24x24xf32>
    %cst_19 = arith.constant dense<0xFF800000> : vector<24xf32>
    %47 = vector.multi_reduction <maximumf>, %46, %cst_19 [1] : vector<24x24xf32> to vector<24xf32>
    %48 = vector.shape_cast %47 : vector<24xf32> to vector<24x1xf32>
    %49 = vector.broadcast %48 : vector<24x1xf32> to vector<24x24xf32>
    %50 = arith.subf %46, %49 : vector<24x24xf32>
    %51 = math.exp %50 : vector<24x24xf32>
    %cst_20 = arith.constant dense<0.000000e+00> : vector<24xf32>
    %52 = vector.multi_reduction <add>, %51, %cst_20 [1] : vector<24x24xf32> to vector<24xf32>
    %53 = vector.shape_cast %52 : vector<24xf32> to vector<24x1xf32>
    %54 = vector.broadcast %53 : vector<24x1xf32> to vector<24x24xf32>
    %55 = arith.divf %51, %54 : vector<24x24xf32>
    %cst_21 = arith.constant dense<0.000000e+00> : vector<24x16xf32>
    %56 = tpu.matmul %55, %42, %cst_21 {dimension_numbers = #tpu.dot_dimension_numbers<[1], [0], [0], [1], [0, 0, 1, 1], [], []>} : vector<24x24xf32>, vector<24x16xf32>, vector<24x16xf32> -> vector<24x16xf32>
    %57 = vector.extract_strided_slice %27 {offsets = [0, 16], sizes = [24, 16], strides = [1, 1]} : vector<24x64xf32> to vector<24x16xf32>
    %58 = vector.extract_strided_slice %32 {offsets = [0, 16], sizes = [24, 16], strides = [1, 1]} : vector<24x64xf32> to vector<24x16xf32>
    %59 = vector.extract_strided_slice %33 {offsets = [0, 16], sizes = [24, 16], strides = [1, 1]} : vector<24x64xf32> to vector<24x16xf32>
    %cst_22 = arith.constant dense<0.000000e+00> : vector<24x24xf32>
    %60 = tpu.matmul %57, %58, %cst_22 {dimension_numbers = #tpu.dot_dimension_numbers<[1], [1], [0], [0], [0, 0, 1, 0], [], []>} : vector<24x16xf32>, vector<24x16xf32>, vector<24x24xf32> -> vector<24x24xf32>
    %cst_23 = arith.constant 2.500000e-01 : f32
    %61 = vector.broadcast %cst_23 : f32 to vector<24x24xf32>
    %62 = arith.mulf %60, %61 : vector<24x24xf32>
    %63 = arith.addf %62, %39 : vector<24x24xf32>
    %cst_24 = arith.constant dense<0xFF800000> : vector<24xf32>
    %64 = vector.multi_reduction <maximumf>, %63, %cst_24 [1] : vector<24x24xf32> to vector<24xf32>
    %65 = vector.shape_cast %64 : vector<24xf32> to vector<24x1xf32>
    %66 = vector.broadcast %65 : vector<24x1xf32> to vector<24x24xf32>
    %67 = arith.subf %63, %66 : vector<24x24xf32>
    %68 = math.exp %67 : vector<24x24xf32>
    %cst_25 = arith.constant dense<0.000000e+00> : vector<24xf32>
    %69 = vector.multi_reduction <add>, %68, %cst_25 [1] : vector<24x24xf32> to vector<24xf32>
    %70 = vector.shape_cast %69 : vector<24xf32> to vector<24x1xf32>
    %71 = vector.broadcast %70 : vector<24x1xf32> to vector<24x24xf32>
    %72 = arith.divf %68, %71 : vector<24x24xf32>
    %cst_26 = arith.constant dense<0.000000e+00> : vector<24x16xf32>
    %73 = tpu.matmul %72, %59, %cst_26 {dimension_numbers = #tpu.dot_dimension_numbers<[1], [0], [0], [1], [0, 0, 1, 1], [], []>} : vector<24x24xf32>, vector<24x16xf32>, vector<24x16xf32> -> vector<24x16xf32>
    %74 = vector.extract_strided_slice %27 {offsets = [0, 32], sizes = [24, 16], strides = [1, 1]} : vector<24x64xf32> to vector<24x16xf32>
    %75 = vector.extract_strided_slice %32 {offsets = [0, 32], sizes = [24, 16], strides = [1, 1]} : vector<24x64xf32> to vector<24x16xf32>
    %76 = vector.extract_strided_slice %33 {offsets = [0, 32], sizes = [24, 16], strides = [1, 1]} : vector<24x64xf32> to vector<24x16xf32>
    %cst_27 = arith.constant dense<0.000000e+00> : vector<24x24xf32>
    %77 = tpu.matmul %74, %75, %cst_27 {dimension_numbers = #tpu.dot_dimension_numbers<[1], [1], [0], [0], [0, 0, 1, 0], [], []>} : vector<24x16xf32>, vector<24x16xf32>, vector<24x24xf32> -> vector<24x24xf32>
    %cst_28 = arith.constant 2.500000e-01 : f32
    %78 = vector.broadcast %cst_28 : f32 to vector<24x24xf32>
    %79 = arith.mulf %77, %78 : vector<24x24xf32>
    %80 = arith.addf %79, %39 : vector<24x24xf32>
    %cst_29 = arith.constant dense<0xFF800000> : vector<24xf32>
    %81 = vector.multi_reduction <maximumf>, %80, %cst_29 [1] : vector<24x24xf32> to vector<24xf32>
    %82 = vector.shape_cast %81 : vector<24xf32> to vector<24x1xf32>
    %83 = vector.broadcast %82 : vector<24x1xf32> to vector<24x24xf32>
    %84 = arith.subf %80, %83 : vector<24x24xf32>
    %85 = math.exp %84 : vector<24x24xf32>
    %cst_30 = arith.constant dense<0.000000e+00> : vector<24xf32>
    %86 = vector.multi_reduction <add>, %85, %cst_30 [1] : vector<24x24xf32> to vector<24xf32>
    %87 = vector.shape_cast %86 : vector<24xf32> to vector<24x1xf32>
    %88 = vector.broadcast %87 : vector<24x1xf32> to vector<24x24xf32>
    %89 = arith.divf %85, %88 : vector<24x24xf32>
    %cst_31 = arith.constant dense<0.000000e+00> : vector<24x16xf32>
    %90 = tpu.matmul %89, %76, %cst_31 {dimension_numbers = #tpu.dot_dimension_numbers<[1], [0], [0], [1], [0, 0, 1, 1], [], []>} : vector<24x24xf32>, vector<24x16xf32>, vector<24x16xf32> -> vector<24x16xf32>
    %91 = vector.extract_strided_slice %27 {offsets = [0, 48], sizes = [24, 16], strides = [1, 1]} : vector<24x64xf32> to vector<24x16xf32>
    %92 = vector.extract_strided_slice %32 {offsets = [0, 48], sizes = [24, 16], strides = [1, 1]} : vector<24x64xf32> to vector<24x16xf32>
    %93 = vector.extract_strided_slice %33 {offsets = [0, 48], sizes = [24, 16], strides = [1, 1]} : vector<24x64xf32> to vector<24x16xf32>
    %cst_32 = arith.constant dense<0.000000e+00> : vector<24x24xf32>
    %94 = tpu.matmul %91, %92, %cst_32 {dimension_numbers = #tpu.dot_dimension_numbers<[1], [1], [0], [0], [0, 0, 1, 0], [], []>} : vector<24x16xf32>, vector<24x16xf32>, vector<24x24xf32> -> vector<24x24xf32>
    %cst_33 = arith.constant 2.500000e-01 : f32
    %95 = vector.broadcast %cst_33 : f32 to vector<24x24xf32>
    %96 = arith.mulf %94, %95 : vector<24x24xf32>
    %97 = arith.addf %96, %39 : vector<24x24xf32>
    %cst_34 = arith.constant dense<0xFF800000> : vector<24xf32>
    %98 = vector.multi_reduction <maximumf>, %97, %cst_34 [1] : vector<24x24xf32> to vector<24xf32>
    %99 = vector.shape_cast %98 : vector<24xf32> to vector<24x1xf32>
    %100 = vector.broadcast %99 : vector<24x1xf32> to vector<24x24xf32>
    %101 = arith.subf %97, %100 : vector<24x24xf32>
    %102 = math.exp %101 : vector<24x24xf32>
    %cst_35 = arith.constant dense<0.000000e+00> : vector<24xf32>
    %103 = vector.multi_reduction <add>, %102, %cst_35 [1] : vector<24x24xf32> to vector<24xf32>
    %104 = vector.shape_cast %103 : vector<24xf32> to vector<24x1xf32>
    %105 = vector.broadcast %104 : vector<24x1xf32> to vector<24x24xf32>
    %106 = arith.divf %102, %105 : vector<24x24xf32>
    %cst_36 = arith.constant dense<0.000000e+00> : vector<24x16xf32>
    %107 = tpu.matmul %106, %93, %cst_36 {dimension_numbers = #tpu.dot_dimension_numbers<[1], [0], [0], [1], [0, 0, 1, 1], [], []>} : vector<24x24xf32>, vector<24x16xf32>, vector<24x16xf32> -> vector<24x16xf32>
    %108 = tpu.concatenate %56, %73, %90, %107 in 1 : vector<24x16xf32>, vector<24x16xf32>, vector<24x16xf32>, vector<24x16xf32> -> vector<24x64xf32>
    %c0_37 = arith.constant 0 : index
    %c0_38 = arith.constant 0 : index
    %c0_39 = arith.constant 0 : index
    %109 = vector.load %arg8[%c0_37, %c0_38, %c0_39] : memref<1x64x64xf32, #tpu.memory_space<vmem>>, vector<1x64x64xf32>
    %110 = vector.shape_cast %109 : vector<1x64x64xf32> to vector<64x64xf32>
    %cst_40 = arith.constant dense<0.000000e+00> : vector<24x64xf32>
    %111 = tpu.matmul %108, %110, %cst_40 {dimension_numbers = #tpu.dot_dimension_numbers<[1], [0], [0], [1], [0, 0, 1, 1], [], []>} : vector<24x64xf32>, vector<64x64xf32>, vector<24x64xf32> -> vector<24x64xf32>
    %112 = arith.addf %3, %111 : vector<24x64xf32>
    %c0_41 = arith.constant 0 : index
    %c0_42 = arith.constant 0 : index
    %c0_43 = arith.constant 0 : index
    %113 = vector.load %arg6[%c0_41, %c0_42, %c0_43] : memref<1x1x64xf32, #tpu.memory_space<vmem>>, vector<1x1x64xf32>
    %114 = vector.shape_cast %113 : vector<1x1x64xf32> to vector<1x64xf32>
    %115 = arith.mulf %112, %112 : vector<24x64xf32>
    %cst_44 = arith.constant dense<0.000000e+00> : vector<24xf32>
    %116 = vector.multi_reduction <add>, %115, %cst_44 [1] : vector<24x64xf32> to vector<24xf32>
    %117 = vector.shape_cast %116 : vector<24xf32> to vector<24x1xf32>
    %cst_45 = arith.constant 6.400000e+01 : f32
    %118 = vector.broadcast %cst_45 : f32 to vector<24x1xf32>
    %119 = arith.divf %117, %118 : vector<24x1xf32>
    %cst_46 = arith.constant 9.99999997E-7 : f32
    %120 = vector.broadcast %cst_46 : f32 to vector<24x1xf32>
    %121 = arith.addf %119, %120 : vector<24x1xf32>
    %122 = math.rsqrt %121 : vector<24x1xf32>
    %123 = vector.broadcast %122 : vector<24x1xf32> to vector<24x64xf32>
    %124 = arith.mulf %112, %123 : vector<24x64xf32>
    %125 = vector.broadcast %114 : vector<1x64xf32> to vector<24x64xf32>
    %126 = arith.mulf %124, %125 : vector<24x64xf32>
    %c0_47 = arith.constant 0 : index
    %c0_48 = arith.constant 0 : index
    %c0_49 = arith.constant 0 : index
    %127 = vector.load %arg9[%c0_47, %c0_48, %c0_49] : memref<1x64x256xf32, #tpu.memory_space<vmem>>, vector<1x64x256xf32>
    %128 = vector.shape_cast %127 : vector<1x64x256xf32> to vector<64x256xf32>
    %cst_50 = arith.constant dense<0.000000e+00> : vector<24x256xf32>
    %129 = tpu.matmul %126, %128, %cst_50 {dimension_numbers = #tpu.dot_dimension_numbers<[1], [0], [0], [1], [0, 0, 1, 1], [], []>} : vector<24x64xf32>, vector<64x256xf32>, vector<24x256xf32> -> vector<24x256xf32>
    %130 = vector.extract_strided_slice %129 {offsets = [0, 0], sizes = [24, 128], strides = [1, 1]} : vector<24x256xf32> to vector<24x128xf32>
    %131 = vector.extract_strided_slice %129 {offsets = [0, 128], sizes = [24, 128], strides = [1, 1]} : vector<24x256xf32> to vector<24x128xf32>
    %132 = arith.negf %130 : vector<24x128xf32>
    %133 = math.exp %132 : vector<24x128xf32>
    %cst_51 = arith.constant 1.000000e+00 : f32
    %134 = vector.broadcast %cst_51 : f32 to vector<24x128xf32>
    %135 = arith.addf %134, %133 : vector<24x128xf32>
    %136 = arith.divf %134, %135 : vector<24x128xf32>
    %137 = arith.mulf %130, %136 : vector<24x128xf32>
    %138 = arith.mulf %137, %131 : vector<24x128xf32>
    %c0_52 = arith.constant 0 : index
    %c0_53 = arith.constant 0 : index
    %c0_54 = arith.constant 0 : index
    %139 = vector.load %arg10[%c0_52, %c0_53, %c0_54] : memref<1x128x64xf32, #tpu.memory_space<vmem>>, vector<1x128x64xf32>
    %140 = vector.shape_cast %139 : vector<1x128x64xf32> to vector<128x64xf32>
    %cst_55 = arith.constant dense<0.000000e+00> : vector<24x64xf32>
    %141 = tpu.matmul %138, %140, %cst_55 {dimension_numbers = #tpu.dot_dimension_numbers<[1], [0], [0], [1], [0, 0, 1, 1], [], []>} : vector<24x128xf32>, vector<128x64xf32>, vector<24x64xf32> -> vector<24x64xf32>
    %142 = arith.addf %112, %141 : vector<24x64xf32>
    %c0_56 = arith.constant 0 : index
    %c0_57 = arith.constant 0 : index
    %143 = vector.load %arg13[%c0_56, %c0_57] : memref<24x64xf32, #tpu.memory_space<vmem>>, vector<24x64xf32>
    tpu.vector_store %arg13[%c0_56, %c0_57], %142 {strides = array<i32>} : memref<24x64xf32, #tpu.memory_space<vmem>>, vector<24x64xf32>,
    %c1_i32 = arith.constant 1 : i32
    %144 = arith.cmpi eq, %arg1, %c1_i32 : i32
    %145 = arith.extui %144 : i1 to i32
    %c0_i32_58 = arith.constant 0 : i32
    %146 = arith.cmpi ne, %145, %c0_i32_58 : i32
    scf.if %146 {
      %c0_59 = arith.constant 0 : index
      %c0_60 = arith.constant 0 : index
      %147 = vector.load %arg11[%c0_59, %c0_60] : memref<1x64xf32, #tpu.memory_space<vmem>>, vector<1x64xf32>
      %148 = arith.mulf %142, %142 : vector<24x64xf32>
      %cst_61 = arith.constant dense<0.000000e+00> : vector<24xf32>
      %149 = vector.multi_reduction <add>, %148, %cst_61 [1] : vector<24x64xf32> to vector<24xf32>
      %150 = vector.shape_cast %149 : vector<24xf32> to vector<24x1xf32>
      %cst_62 = arith.constant 6.400000e+01 : f32
      %151 = vector.broadcast %cst_62 : f32 to vector<24x1xf32>
      %152 = arith.divf %150, %151 : vector<24x1xf32>
      %cst_63 = arith.constant 9.99999997E-7 : f32
      %153 = vector.broadcast %cst_63 : f32 to vector<24x1xf32>
      %154 = arith.addf %152, %153 : vector<24x1xf32>
      %155 = math.rsqrt %154 : vector<24x1xf32>
      %156 = vector.broadcast %155 : vector<24x1xf32> to vector<24x64xf32>
      %157 = arith.mulf %142, %156 : vector<24x64xf32>
      %158 = vector.broadcast %147 : vector<1x64xf32> to vector<24x64xf32>
      %159 = arith.mulf %157, %158 : vector<24x64xf32>
      %c0_64 = arith.constant 0 : index
      %c0_65 = arith.constant 0 : index
      %160 = vector.load %arg12[%c0_64, %c0_65] : memref<24x64xf32, #tpu.memory_space<vmem>>, vector<24x64xf32>
      tpu.vector_store %arg12[%c0_64, %c0_65], %159 {strides = array<i32>} : memref<24x64xf32, #tpu.memory_space<vmem>>, vector<24x64xf32>,
    } else {
    }
    return
  }
  func.func @transform_0(%arg0: i32, %arg1: i32) -> (i32, i32) {
    %c0_i32 = arith.constant 0 : i32
    %c0_i32_0 = arith.constant 0 : i32
    return %arg0, %c0_i32 : i32, i32
  }
  func.func @transform_1(%arg0: i32, %arg1: i32) -> (i32, i32) {
    %c0_i32 = arith.constant 0 : i32
    %c0_i32_0 = arith.constant 0 : i32
    %c0_i32_1 = arith.constant 0 : i32
    return %c0_i32, %c0_i32_0 : i32, i32
  }
  func.func @transform_2(%arg0: i32, %arg1: i32) -> (i32, i32) {
    %c0_i32 = arith.constant 0 : i32
    %c0_i32_0 = arith.constant 0 : i32
    %c0_i32_1 = arith.constant 0 : i32
    return %c0_i32, %c0_i32_0 : i32, i32
  }
  func.func @transform_3(%arg0: i32, %arg1: i32) -> (i32, i32, i32) {
    %c0_i32 = arith.constant 0 : i32
    %c0_i32_0 = arith.constant 0 : i32
    %c0_i32_1 = arith.constant 0 : i32
    return %arg1, %c0_i32, %c0_i32_0 : i32, i32, i32
  }
  func.func @transform_4(%arg0: i32, %arg1: i32) -> (i32, i32, i32) {
    %c0_i32 = arith.constant 0 : i32
    %c0_i32_0 = arith.constant 0 : i32
    %c0_i32_1 = arith.constant 0 : i32
    return %arg1, %c0_i32, %c0_i32_0 : i32, i32, i32
  }
  func.func @transform_5(%arg0: i32, %arg1: i32) -> (i32, i32, i32) {
    %c0_i32 = arith.constant 0 : i32
    %c0_i32_0 = arith.constant 0 : i32
    %c0_i32_1 = arith.constant 0 : i32
    return %arg1, %c0_i32, %c0_i32_0 : i32, i32, i32
  }
  func.func @transform_6(%arg0: i32, %arg1: i32) -> (i32, i32, i32) {
    %c0_i32 = arith.constant 0 : i32
    %c0_i32_0 = arith.constant 0 : i32
    %c0_i32_1 = arith.constant 0 : i32
    return %arg1, %c0_i32, %c0_i32_0 : i32, i32, i32
  }
  func.func @transform_7(%arg0: i32, %arg1: i32) -> (i32, i32, i32) {
    %c0_i32 = arith.constant 0 : i32
    %c0_i32_0 = arith.constant 0 : i32
    %c0_i32_1 = arith.constant 0 : i32
    return %arg1, %c0_i32, %c0_i32_0 : i32, i32, i32
  }
  func.func @transform_8(%arg0: i32, %arg1: i32) -> (i32, i32, i32) {
    %c0_i32 = arith.constant 0 : i32
    %c0_i32_0 = arith.constant 0 : i32
    %c0_i32_1 = arith.constant 0 : i32
    return %arg1, %c0_i32, %c0_i32_0 : i32, i32, i32
  }
  func.func @transform_9(%arg0: i32, %arg1: i32) -> (i32, i32) {
    %c0_i32 = arith.constant 0 : i32
    %c0_i32_0 = arith.constant 0 : i32
    %c0_i32_1 = arith.constant 0 : i32
    return %c0_i32, %c0_i32_0 : i32, i32
  }
  func.func @transform_10(%arg0: i32, %arg1: i32) -> (i32, i32) {
    %c0_i32 = arith.constant 0 : i32
    %c0_i32_0 = arith.constant 0 : i32
    return %arg0, %c0_i32 : i32, i32
  }
}

module attributes {stable_mosaic.version = 11 : i64} {
  func.func @_heads_kernel(%arg0: i32, %arg1: memref<32x64xf32, #tpu.memory_space<vmem>>, %arg2: memref<64x128xf32, #tpu.memory_space<vmem>>, %arg3: memref<32x128xf32, #tpu.memory_space<vmem>>) attributes {dimension_semantics = [#tpu.dimension_semantics<arbitrary>], iteration_bounds = array<i64: 1>, scalar_prefetch = 0 : i64, scratch_operands = 0 : i64, tpu.core_type = #tpu.core_type<tc>, window_params = [{pipeline_mode = #tpu.pipeline_mode<synchronous>, transform_indices = @transform_0, window_bounds = array<i64: 32, 64>}, {pipeline_mode = #tpu.pipeline_mode<synchronous>, transform_indices = @transform_1, window_bounds = array<i64: 64, 128>}, {pipeline_mode = #tpu.pipeline_mode<synchronous>, transform_indices = @transform_2, window_bounds = array<i64: 32, 128>}]} {
    %c0 = arith.constant 0 : index
    %c0_0 = arith.constant 0 : index
    %0 = vector.load %arg1[%c0, %c0_0] : memref<32x64xf32, #tpu.memory_space<vmem>>, vector<32x64xf32>
    %c0_1 = arith.constant 0 : index
    %c0_2 = arith.constant 0 : index
    %1 = vector.load %arg2[%c0_1, %c0_2] : memref<64x128xf32, #tpu.memory_space<vmem>>, vector<64x128xf32>
    %cst = arith.constant dense<0.000000e+00> : vector<32x128xf32>
    %2 = tpu.matmul %0, %1, %cst {dimension_numbers = #tpu.dot_dimension_numbers<[1], [0], [0], [1], [0, 0, 1, 1], [], []>} : vector<32x64xf32>, vector<64x128xf32>, vector<32x128xf32> -> vector<32x128xf32>
    %c0_3 = arith.constant 0 : index
    %c0_4 = arith.constant 0 : index
    %3 = vector.load %arg3[%c0_3, %c0_4] : memref<32x128xf32, #tpu.memory_space<vmem>>, vector<32x128xf32>
    tpu.vector_store %arg3[%c0_3, %c0_4], %2 {strides = array<i32>} : memref<32x128xf32, #tpu.memory_space<vmem>>, vector<32x128xf32>,
    return
  }
  func.func @transform_0(%arg0: i32) -> (i32, i32) {
    %c0_i32 = arith.constant 0 : i32
    %c0_i32_0 = arith.constant 0 : i32
    %c0_i32_1 = arith.constant 0 : i32
    return %c0_i32, %c0_i32_0 : i32, i32
  }
  func.func @transform_1(%arg0: i32) -> (i32, i32) {
    %c0_i32 = arith.constant 0 : i32
    %c0_i32_0 = arith.constant 0 : i32
    %c0_i32_1 = arith.constant 0 : i32
    return %c0_i32, %c0_i32_0 : i32, i32
  }
  func.func @transform_2(%arg0: i32) -> (i32, i32) {
    %c0_i32 = arith.constant 0 : i32
    %c0_i32_0 = arith.constant 0 : i32
    %c0_i32_1 = arith.constant 0 : i32
    return %c0_i32, %c0_i32_0 : i32, i32
  }
}

</mosaic_0001>

<bundles_post_ra>
// kernel: t3_forward.3
= control target key start
LH: loop header
LB: loop body
LE: loop exit
PB: predicated region body
PF: predicated region fallthrough
CT: control target
= control target key end

     0   :  { %vm23_vm0 = vcmask 523264   ;;  %s164_s1 = inlined_call_operand.vmem [shape: f32[64,128], index: 1, kind: input, shape index: {}]   ;;  %s165_s0 = inlined_call_operand.vmem [shape: f32[32,64], index: 0, kind: input, shape index: {}]   ;;  %s166_s2 = inlined_call_operand.vmem [shape: f32[32,128], index: 2, kind: output, shape index: {}]  }
   0x1   :  { %v22_v0 = vld [vmem:[%s164_s1 + $0x38] sm:$0xff]  ;;  %v21_v1 = vld [vmem:[%s164_s1 + $0x30] sm:$0xff]  ;;  %v20_v2 = vld [vmem:[%s164_s1 + $0x28] sm:$0xff] }
   0x2   :  { %78 = vmatpush.msra.mxu2 %v22_v0  ;;  %79 = vmatpush.msra.mxu3 %v22_v0  ;;  %v19_v3 = vld [vmem:[%s164_s1 + $0x20] sm:$0xff]  ;;  %v18_v4 = vld [vmem:[%s164_s1 + $0x18] sm:$0xff]  ;;  %v17_v5 = vld [vmem:[%s164_s1 + $0x10] sm:$0xff] }
   0x3   :  { %44 = vmatpush.msra.mxu0 %v22_v0  ;;  %77 = vmatpush.msra.mxu1 %v22_v0  ;;  %v16_v6 = vld [vmem:[%s164_s1 + $0x8] sm:$0xff]  ;;  %v15_v7 = vld [vmem:[%s164_s1] sm:$0xff]  ;;  %v13_v8 = vld [vmem:[%s165_s0 + $0x10] sm:$0xff] }
   0x4   :  { %81 = vmatpush.msra.mxu2 %v21_v1  ;;  %82 = vmatpush.msra.mxu3 %v21_v1  ;;  %v14_v9 = vld [vmem:[%s165_s0 + $0x18] sm:$0xff]  ;;  %v11_v10 = vld [vmem:[%s165_s0] sm:$0xff]  ;;  %v12_v11 = vld [vmem:[%s165_s0 + $0x8] sm:$0xff] }
   0x5   :  { %45 = vmatpush.msra.mxu0 %v21_v1  ;;  %80 = vmatpush.msra.mxu1 %v21_v1 }
   0x6   :  { %84 = vmatpush.msra.mxu2 %v20_v2  ;;  %85 = vmatpush.msra.mxu3 %v20_v2 }
   0x7   :  { %46 = vmatpush.msra.mxu0 %v20_v2  ;;  %83 = vmatpush.msra.mxu1 %v20_v2 }
   0x8   :  { %87 = vmatpush.msra.mxu2 %v19_v3  ;;  %88 = vmatpush.msra.mxu3 %v19_v3 }
   0x9   :  { %47 = vmatpush.msra.mxu0 %v19_v3  ;;  %86 = vmatpush.msra.mxu1 %v19_v3 }
   0xa   :  { %90 = vmatpush.msra.mxu2 %v18_v4  ;;  %91 = vmatpush.msra.mxu3 %v18_v4 }
   0xb   :  { %48 = vmatpush.msra.mxu0 %v18_v4  ;;  %89 = vmatpush.msra.mxu1 %v18_v4 }
   0xc   :  { %93 = vmatpush.msra.mxu2 %v17_v5  ;;  %94 = vmatpush.msra.mxu3 %v17_v5 }
   0xd   :  { %49 = vmatpush.msra.mxu0 %v17_v5  ;;  %92 = vmatpush.msra.mxu1 %v17_v5 }
   0xe   :  { %96 = vmatpush.msra.mxu2 %v16_v6  ;;  %97 = vmatpush.msra.mxu3 %v16_v6 }
   0xf   :  { %50 = vmatpush.msra.mxu0 %v16_v6  ;;  %95 = vmatpush.msra.mxu1 %v16_v6 }
  0x10   :  { %99 = vmatpush.msra.mxu2 %v15_v7  ;;  %100 = vmatpush.msra.mxu3 %v15_v7 }
  0x11   :  { %75 = vmatmul.msk.f32.vlgmr.msra.gmra.mxu2 %vm23_vm0, %v13_v8  ;;  %76 = vmatmul.msk.f32.vlgmr.msra.gmra.mxu3 %vm23_vm0, %v14_v9 }
  0x12   :  { %51 = vmatpush.msra.mxu0 %v15_v7  ;;  %98 = vmatpush.msra.mxu1 %v15_v7 }
  0x13   :  { %73 = vmatmul.msk.f32.vlgmr.msra.gmra.mxu0 %vm23_vm0, %v11_v10  ;;  %74 = vmatmul.msk.f32.vlgmr.msra.gmra.mxu1 %vm23_vm0, %v12_v11 }
  0x90   :  { %v53_v12 = vpop.f32.mrf.mxu0  ;;  %v56_v13 = vpop.f32.mrf.mxu1 }
  0x91   :  { %65 = vst [vmem:[%s166_s2] sm:$0xff] %v53_v12 }
  0x92   :  { %66 = vst [vmem:[%s166_s2 + $0x8] sm:$0xff] %v56_v13 }
  0x94   :  { %v59_v14 = vpop.f32.mrf.mxu2  ;;  %v62_v15 = vpop.f32.mrf.mxu3 }
  0x95   :  { %67 = vst [vmem:[%s166_s2 + $0x10] sm:$0xff] %v59_v14 }
  0x96   :  { %68 = vst [vmem:[%s166_s2 + $0x18] sm:$0xff] %v62_v15 }

// kernel: t3_forward.2
= control target key start
LH: loop header
LB: loop body
LE: loop exit
PB: predicated region body
PF: predicated region fallthrough
CT: control target
= control target key end

     0   :  { %s2321_s13 = smov 0   ;;  %s2323_s14 = smov 0   ;;  %s2903_s0 = inlined_call_operand.vmem [shape: f32[48,64], index: 0, kind: input, shape index: {}]   ;;  %s2904_s1 = inlined_call_operand.vmem [shape: f32[24,64], index: 1, kind: input, shape index: {}]   ;;  %s2905_s2 = inlined_call_operand.vmem [shape: f32[24,64], index: 2, kind: input, shape index: {}]   ;;  %s2906_s3 = inlined_call_operand.vmem [shape: f32[2,1,64], index: 3, kind: input, shape index: {}]   ;;  %s2907_s4 = inlined_call_operand.vmem [shape: f32[2,1,64], index: 4, kind: input, shape index: {}]   ;;  %s2908_s5 = inlined_call_operand.vmem [shape: f32[2,64,320], index: 5, kind: input, shape index: {}]   ;;  %s2909_s6 = inlined_call_operand.vmem [shape: f32[2,64,64], index: 6, kind: input, shape index: {}]   ;;  %s2910_s7 = inlined_call_operand.vmem [shape: f32[2,64,256], index: 7, kind: input, shape index: {}]   ;;  %s2911_s8 = inlined_call_operand.vmem [shape: f32[2,128,64], index: 8, kind: input, shape index: {}]   ;;  %s2912_s9 = inlined_call_operand.vmem [shape: f32[1,64], index: 9, kind: input, shape index: {}]   ;;  %s2913_s10 = inlined_call_operand.vmem [shape: f32[48,64], index: 10, kind: output, shape index: {}]  }
   0x1   :  { %s2325_s15 = smov 0   ;;  %s2327_s16 = smov 0  }
   0x2   :  { %s2329_s17 = smov 0  }
   0x3 LB: > { %2917 = sst [smem:[#allocation3_spill]] %s2247_s15  ;;  %s29_s18 = sadd.s32 1, %s2247_s15  ;;  %s2255_s17 = sphi %s2329_s17, %s20_s17   ;;  %s2251_s16 = sphi %s2327_s16, %s2930_s16   ;;  %s2247_s15 = sphi %s2325_s15, %s2929_s15   ;;  %s2243_s14 = sphi %s2323_s14, %s2928_s14   ;;  %s2239_s13 = sphi %s2321_s13, %s2927_s13  }
   0x4   : > { %2918 = sst [smem:[#allocation4_spill]] %s2251_s16  ;;  %s32_s19 = sadd.s32 1, %s2251_s16 }
   0x5   : > { %2919 = sst [smem:[#allocation5_spill]] %s2255_s17  ;;  %p30_p0 = scmp.ge.s32.totalorder %s29_s18, 2 }
   0x6   : > { %p1984_p1 = scmp.ge.s32.totalorder %s2255_s17, 1  ;;  %p381_p2 = scmp.lt.s32.totalorder %s2255_s17, 5 }
   0x7   : > { %s2932_s18 = smov (%p30_p0, %s29_s18), 0  ;;  %s2934_s19 = smov (!%p30_p0, %s32_s19), %s2251_s16 }
   0x8   : > { %2920 = sst [smem:[#allocation6_spill]] %s2932_s18  ;;  %p382_p3 = pnand %p1984_p1, %p381_p2 }
   0x9   : > { %p34_p4 = scmp.ge.s32.totalorder %s2934_s19, 2  ;;  %s445_s20 = smul.u32 (!%p382_p3), 3, %s2243_s14 }
   0xa   : > { %385 = sbr.rel (%p382_p3) target bundleno = 2048 (0x800), region = 60  ;;  %p451_p5 = scmp.lt.s32.totalorder (!%p382_p3), %s2239_s13, 1 }
   0xb   : > { %s2936_s19 = smov (%p34_p4, %s2934_s19), 0  ;;  %p446_p6 = scmp.lt.s32.totalorder (!%p382_p3), %s445_s20, 5 }
   0xc   : > { %2921 = sst [smem:[#allocation7_spill]] %s2936_s19  ;;  %p1994_p7 = scmp.ne.s32.totalorder (!%p382_p3), %s2239_s13, 0 }
   0xf   : > { %s2355_s21 = scalar_select %p451_p5, %s2239_s13, 1 }
  0x10   : > { %s2938_s20 = smov (!%p446_p6, %s445_s20), 5 }
  0x11   : > { %s1985_s28 = sshll.u32 %s2938_s20, 3  ;;  %s2066_s29 = smul.u32 192, %s2355_s21 }
  0x12   : > { %s449_s12 = scalar_lea.vmem %s2903_s0, %s1985_s28  ;;  %s2055_s14 = sshll.u32 %s2355_s21, 6 }
  0x13   : > { %s2373_s16 = scalar_lea.vmem %s2908_s5, %s2066_s29  ;;  %s2378_s22 = scalar_lea.vmem %s2909_s6, %s2055_s14 }
  0x14   : > { %s2056_s23 = sshll.u32 %s2355_s21, 7  ;;  %s2384_s20 = scalar_lea.vmem %s2913_s10, %s1985_s28 }
  0x15   : > { %s2389_s11 = scalar_lea.vmem %s2910_s7, %s2056_s23  ;;  %s2394_s19 = scalar_lea.vmem %s2911_s8, %s2056_s23 }
  0x16   : > { %486 = sbr.rel (%p1994_p7) target bundleno = 31 (0x1f), region = 64 }
  0x1b   : > { %v487_v0 = vld [vmem:[%s449_s12] sm:$0xff]  ;;  %vm490_vm0 = vcmask 523264   ;;  %v488_v1 = vld [vmem:[%s449_s12 + $0x8] sm:$0xff]  ;;  %v489_v2 = vld [vmem:[%s449_s12 + $0x10] sm:$0xff] }
  0x1c   : > { %491 = vst.msk [vmem:[#allocation2] sm:$0xff] %vm490_vm0, %v487_v0 }
  0x1d   : > { %492 = vst.msk [vmem:[#allocation2 + $0x8] sm:$0xff] %vm490_vm0, %v488_v1 }
  0x1e   : > { %493 = vst.msk [vmem:[#allocation2 + $0x10] sm:$0xff] %vm490_vm0, %v489_v2 }
  0x1f PF: > { %vm501_vm1 = vcmask 523264   ;;  %v2257_v12 = vmov 64.0   ;;  %v584_v14 = vld [vmem:[%s2373_s16 + $0xa8] sm:$0xff]  ;;  %v585_v15 = vld [vmem:[%s2373_s16 + $0xb0] sm:$0xff]  ;;  %v582_v18 = vld [vmem:[%s2373_s16 + $0x98] sm:$0xff]  ;;  %s2258_s24 = smov 64   ;;  %s2922_s26 = scalar_lea.vmem %s2906_s3, %s2355_s21 }
  0x20   : > { %2133 = vrcp.f32 %v2257_v12  ;;  %604 = vmatpush.msra.mxu0 %v584_v14  ;;  %2058 = vmatpush.msra.mxu2 %v585_v15  ;;  %v581_v17 = vld [vmem:[%s2373_s16 + $0x90] sm:$0xff]  ;;  %v578_v19 = vld [vmem:[%s2373_s16 + $0x78] sm:$0xff]  ;;  %v579_v20 = vld [vmem:[%s2373_s16 + $0x80] sm:$0xff]  ;;  %s2259_s27 = smov 48   ;;  %s2260_s28 = smov 112   ;;  %vm767_vm12 = vcmask 130048  }
  0x21   : > { %630 = vmatpush.msra.mxu1 %v585_v15  ;;  %v575_v22 = vld [vmem:[%s2373_s16 + $0x60] sm:$0xff]  ;;  %v576_v23 = vld [vmem:[%s2373_s16 + $0x68] sm:$0xff]  ;;  %v573_v25 = vld [vmem:[%s2373_s16 + $0x50] sm:$0xff]  ;;  %s2263_s29 = smov 96   ;;  %s2264_s12 = smov 80   ;;  %vm815_vm14 = vcmask 195584  }
  0x22   : > { %605 = vmatpush.msra.mxu0 %v581_v17  ;;  %2059 = vmatpush.msra.mxu2 %v582_v18  ;;  %v572_v24 = vld [vmem:[%s2373_s16 + $0x48] sm:$0xff]  ;;  %v569_v27 = vld [vmem:[%s2373_s16 + $0x30] sm:$0xff]  ;;  %v570_v28 = vld [vmem:[%s2373_s16 + $0x38] sm:$0xff]  ;;  %s2925_s14 = scalar_lea.vmem %s2907_s4, %s2355_s21  ;;  %p2052_p8 = scmp.ne.s32.totalorder %s2239_s13, 1 }
  0x23   : > { %v2399_v4 = vld [vmem:[#allocation2] sm:$0xff]  ;;  %631 = vmatpush.msra.mxu1 %v582_v18  ;;  %v566_v29 = vld [vmem:[%s2373_s16 + $0x18] sm:$0xff]  ;;  %v564_v33 = vld [vmem:[%s2373_s16 + $0x8] sm:$0xff] }
  0x24   : > { %v2397_v3 = vld [vmem:[#allocation2 + $0x8] sm:$0xff]  ;;  %v498_v6 = vmul.f32 %v2399_v4, %v2399_v4  ;;  %606 = vmatpush.msra.mxu0 %v578_v19  ;;  %2060 = vmatpush.msra.mxu2 %v579_v20  ;;  %v567_v30 = vld [vmem:[%s2373_s16 + $0x20] sm:$0xff]  ;;  %v586_v34 = vld [vmem:[%s2373_s16 + $0xb8] sm:$0xff] }
  0x25   : > { %v499_v5 = vmul.f32 %v2397_v3, %v2397_v3  ;;  %v2405_v7 = vld [vmem:[#allocation2 + $0x10] sm:$0xff]  ;;  %632 = vmatpush.msra.mxu1 %v579_v20  ;;  %v563_v32 = vld [vmem:[%s2373_s16] sm:$0xff]  ;;  %v580_v38 = vld [vmem:[%s2373_s16 + $0x88] sm:$0xff] }
  0x26   : > { %v502_v9 = vsel %vm501_vm1, %v498_v6, 0.0  ;;  %v500_v10 = vmul.f32 %v2405_v7, %v2405_v7  ;;  %v2134_v13 = vpop.eup %2133  ;;  %607 = vmatpush.msra.mxu0 %v575_v22  ;;  %2061 = vmatpush.msra.mxu2 %v576_v23  ;;  %v583_v35 = vld [vmem:[%s2373_s16 + $0xa0] sm:$0xff]  ;;  %v577_v41 = vld [vmem:[%s2373_s16 + $0x70] sm:$0xff]  ;;  %v574_v46 = vld [vmem:[%s2373_s16 + $0x58] sm:$0xff] }
  0x27   : > { %v505_v8 = vsel %vm501_vm1, %v499_v5, 0.0  ;;  %503 = vadd.xlane.f32.xlu1 %v502_v9  ;;  %v512_v16 = vmul.f32 64.0, %v2134_v13  ;;  %633 = vmatpush.msra.mxu1 %v576_v23  ;;  %vm516_vm2 = vweird.f32 %v2134_v13  ;;  %v2433_v36 = vld [vmem:[%s2905_s2] sm:$0xff]  ;;  %v568_v49 = vld [vmem:[%s2373_s16 + $0x28] sm:$0xff]  ;;  %v565_v51 = vld [vmem:[%s2373_s16 + $0x10] sm:$0xff] }
  0x28   : > { %506 = vadd.xlane.f32.xlu0 %v505_v8  ;;  %v508_v11 = vsel %vm501_vm1, %v500_v10, 0.0  ;;  %608 = vmatpush.msra.mxu0 %v572_v24  ;;  %v571_v47 = vld [vmem:[%s2373_s16 + $0x40] sm:$0xff]  ;;  %v679_v1 = vld [vmem:[%s2905_s2 + $0x10] sm:$0xff]  ;;  %v678_v2 = vld [vmem:[%s2905_s2 + $0x8] sm:$0xff]  ;;  %s2261_s16 = smov 32  }
  0x29   : > { %v513_v21 = vsub.f32 1.0, %v512_v16  ;;  %2062 = vmatpush.msra.mxu2 %v573_v25  ;;  %634 = vmatpush.msra.mxu1 %v573_v25  ;;  %v2448_v48 = vld [vmem:[%s2904_s1] sm:$0xff]  ;;  %v2474_v19 = vld [vmem:[%s2904_s1 + $0x10] sm:$0xff]  ;;  %v675_v22 = vld [vmem:[%s2904_s1 + $0x8] sm:$0xff] }
  0x2a   : > { %609 = vmatpush.msra.mxu0 %v569_v27  ;;  %688 = vrot.lane.b32.xlu2 %v678_v2, %s2258_s24  ;;  %v2131_v9 = vld [vmem:[%s2922_s26] ss:$0 sm:$0xff] }
  0x2b   : > { %v514_v26 = vmul.f32 %v2134_v13, %v513_v21  ;;  %2063 = vmatpush.msra.mxu2 %v570_v28  ;;  %635 = vmatpush.msra.mxu1 %v570_v28 }
  0x2c   : > { %610 = vmatpush.msra.mxu0 %v566_v29 }
  0x2d   : > { %2064 = vmatpush.msra.mxu2 %v567_v30  ;;  %v515_v31 = vadd.f32 %v2134_v13, %v514_v26  ;;  %636 = vmatpush.msra.mxu1 %v567_v30 }
  0x2e   : > { %611 = vmatpush.msra.mxu0 %v563_v32 }
  0x2f   : > { %2065 = vmatpush.msra.mxu2 %v564_v33  ;;  %637 = vmatpush.msra.mxu1 %v564_v33  ;;  %v2437_v37 = vsel %vm516_vm2, %v2134_v13, %v515_v31 }
  0x30   : > { %509 = vadd.xlane.f32.xlu0 %v508_v11 }
  0x31   : > { %656 = vmatpush.msrb.mxu2 %v586_v34 }
  0x32   : > { %720 = vrot.lane.b32.xlu2 %v2474_v19, %s2258_s24 }
  0x33   : > { %657 = vmatpush.msrb.mxu2 %v583_v35 }
  0x35   : > { %658 = vmatpush.msrb.mxu2 %v580_v38 }
  0x37   : > { %659 = vmatpush.msrb.mxu2 %v577_v41 }
  0x39   : > { %660 = vmatpush.msrb.mxu2 %v574_v46 }
  0x3a   : > { %718 = vrot.lane.b32.xlu2 %v675_v22, %s2258_s24 }
  0x3b   : > { %661 = vmatpush.msrb.mxu2 %v571_v47 }
  0x3d   : > { %662 = vmatpush.msrb.mxu2 %v568_v49 }
  0x3f   : > { %663 = vmatpush.msrb.mxu2 %v565_v51 }
  0x40   : > { %686 = vrot.lane.b32.xlu1 %v2433_v36, %s2258_s24 }
  0x44   : > { %690 = vrot.lane.b32.xlu0 %v679_v1, %s2258_s24 }
  0x48   : > { %716 = vrot.lane.b32.xlu1 %v2448_v48, %s2258_s24 }
  0x9a   : > { %v504_v40 = vpop.xlane.xlu1 %503 }
  0x9b   : > { %v507_v39 = vpop.xlane.xlu0 %506  ;;  %v518_v43 = vmul.f32 %v2437_v37, %v504_v40 }
  0x9c   : > { %v519_v42 = vmul.f32 %v2437_v37, %v507_v39 }
  0x9d   : > { %v521_v45 = vadd.f32 1e-06, %v518_v43 }
  0x9e   : > { %v522_v44 = vadd.f32 1e-06, %v519_v42 }
  0x9f   : > { %vm530_vm3 = vweird.f32 %v521_v45 }
  0xa0   : > { %2135 = vrsqrt.f32 %v522_v44  ;;  %vm540_vm6 = vweird.f32 %v522_v44 }
  0xa1   : > { %2137 = vrsqrt.f32 %v521_v45 }
  0xa3   : > { %v510_v50 = vpop.xlane.xlu0 %509 }
  0xa4   : > { %v520_v52 = vmul.f32 %v2437_v37, %v510_v50 }
  0xa6   : > { %v2136_v53 = vpop.eup %2135  ;;  %v523_v54 = vadd.f32 1e-06, %v520_v52 }
  0xa7   : > { %v2138_v55 = vpop.eup %2137  ;;  %v535_v56 = vmul.f32 %v2136_v53, %v522_v44  ;;  %vm541_vm5 = vweird.f32 %v2136_v53 }
  0xa8   : > { %v525_v57 = vmul.f32 %v2138_v55, %v521_v45  ;;  %2139 = vrsqrt.f32 %v523_v54  ;;  %vm531_vm4 = vweird.f32 %v2138_v55  ;;  %vm542_vm8 = vmor %vm540_vm6, %vm541_vm5  ;;  %vm550_vm10 = vweird.f32 %v523_v54 }
  0xa9   : > { %v536_v58 = vmul.f32 %v2136_v53, %v535_v56  ;;  %vm532_vm7 = vmor %vm530_vm3, %vm531_vm4 }
  0xaa   : > { %v526_v59 = vmul.f32 %v2138_v55, %v525_v57 }
  0xab   : > { %v537_v60 = vmul.f32 0.5, %v536_v58 }
  0xac   : > { %v527_v61 = vmul.f32 0.5, %v526_v59 }
  0xad   : > { %v538_v62 = vsub.f32 1.5, %v537_v60 }
  0xae   : > { %v2140_v63 = vpop.eup %2139  ;;  %v528_v0 = vsub.f32 1.5, %v527_v61 }
  0xaf   : > { %v539_v5 = vmul.f32 %v2136_v53, %v538_v62  ;;  %v545_v6 = vmul.f32 %v2140_v63, %v523_v54  ;;  %vm551_vm9 = vweird.f32 %v2140_v63 }
  0xb0   : > { %v529_v8 = vmul.f32 %v2138_v55, %v528_v0  ;;  %vm552_vm11 = vmor %vm550_vm10, %vm551_vm9 }
  0xb1   : > { %v546_v10 = vmul.f32 %v2140_v63, %v545_v6  ;;  %v543_v11 = vsel %vm542_vm8, %v2136_v53, %v539_v5 }
  0xb2   : > { %v533_v12 = vsel %vm532_vm7, %v2138_v55, %v529_v8  ;;  %v555_v13 = vmul.f32 %v543_v11, %v2397_v3  ;;  %v687_v35 = vpop.permute.xlu1 %686 }
  0xb3   : > { %v547_v14 = vmul.f32 0.5, %v546_v10  ;;  %v554_v15 = vmul.f32 %v533_v12, %v2399_v4 }
  0xb4   : > { %v561_v16 = vmul.f32 %v2131_v9, %v555_v13 }
  0xb5   : > { %v548_v17 = vsub.f32 1.5, %v547_v14  ;;  %v560_v18 = vmul.f32 %v2131_v9, %v554_v15 }
  0xb6   : > { %1999 = vmatmul.msk.f32.vlgmr.msra.gmra.mxu2 %vm501_vm1, %v561_v16  ;;  %v691_v28 = vpop.permute.xlu0 %690 }
  0xb7   : > { %v549_v20 = vmul.f32 %v2140_v63, %v548_v17  ;;  %1995 = vmatmul.msk.f32.vlgmr.msra.gmra.mxu0 %vm501_vm1, %v560_v18  ;;  %1998 = vmatmul.msk.f32.vlgmr.msra.gmra.mxu1 %vm501_vm1, %v560_v18 }
  0xb9   : > { %v553_v3 = vsel %vm552_vm11, %v2140_v63, %v549_v20 }
  0xba   : > { %v556_v4 = vmul.f32 %v553_v3, %v2405_v7  ;;  %v689_v7 = vpop.permute.xlu2 %688  ;;  %v717_v46 = vpop.permute.xlu1 %716 }
  0xbc   : > { %v562_v21 = vmul.f32 %v2131_v9, %v556_v4 }
  0xbe   : > { %2000 = vmatmul.msk.f32.gmra.mxu2 %vm501_vm1, %v562_v21 }
  0xbf   : > { %1996 = vmatmul.msk.f32.gmra.mxu0 %vm501_vm1, %v561_v16 }
  0xc2   : > { %v721_v39 = vpop.permute.xlu2 %720 }
  0xc6   : > { %2001 = vmatmul.msk.f32.vlgmr.msrb.gmra.mxu2 %vm501_vm1, %v560_v18 }
  0xc7   : > { %1997 = vmatmul.msk.f32.gmra.mxu0 %vm501_vm1, %v562_v21 }
  0xca   : > { %v719_v41 = vpop.permute.xlu2 %718 }
  0xce   : > { %2002 = vmatmul.msk.f32.gmra.mxu2 %vm501_vm1, %v561_v16 }
  0xd6   : > { %2003 = vmatmul.msk.f32.gmra.mxu2 %vm501_vm1, %v562_v21 }
 0x134   : > { %v2503_v34 = vpop.f32.mrf.mxu1  ;;  %v613_v38 = vpop.f32.mrf.mxu0 }
 0x135   : > { %v725_v47 = vmul.f32 %v717_v46, %v613_v38  ;;  %v680_v54 = vmul.f32 %v2448_v48, %v613_v38 }
 0x139   : > { %v2491_v23 = vpop.f32.mrf.mxu2 }
 0x13a   : > { %v696_v24 = vmul.f32 %v689_v7, %v2491_v23 }
 0x13c   : > { %703 = vrot.lane.b32.xlu1 %v696_v24, %s2258_s24  ;;  %v616_v40 = vpop.f32.mrf.mxu0 }
 0x13d   : > { %v726_v49 = vmul.f32 %v719_v41, %v616_v40  ;;  %v681_v58 = vmul.f32 %v675_v22, %v616_v40 }
 0x141   : > { %v2495_v25 = vpop.f32.mrf.mxu2 }
 0x142   : > { %v697_v30 = vmul.f32 %v691_v28, %v2495_v25  ;;  %v2532_v62 = vpack.i.bf16 %v2491_v23, %v2495_v25 }
 0x144   : > { %v619_v42 = vpop.f32.mrf.mxu0 }
 0x145   : > { %v727_v43 = vmul.f32 %v721_v39, %v619_v42  ;;  %v682_v60 = vmul.f32 %v2474_v19, %v619_v42 }
 0x149   : > { %v665_v26 = vpop.f32.mrf.mxu2 }
 0x14a   : > { %v728_v27 = vmul.f32 %v2433_v36, %v665_v26  ;;  %v695_v36 = vmul.f32 %v687_v35, %v2503_v34 }
 0x14c   : > { %734 = vrot.lane.b32.xlu0 %v728_v27, %s2258_s24  ;;  %v2265_v27 = vmov -1e+30  }
 0x151   : > { %v668_v29 = vpop.f32.mrf.mxu2 }
 0x152   : > { %v729_v33 = vmul.f32 %v678_v2, %v668_v29 }
 0x154   : > { %705 = vrot.lane.b32.xlu0 %v697_v30, %s2258_s24 }
 0x159   : > { %v671_v31 = vpop.f32.mrf.mxu2 }
 0x15a   : > { %v730_v32 = vmul.f32 %v679_v1, %v671_v31 }
 0x15c   : > { %738 = vrot.lane.b32.xlu2 %v730_v32, %s2258_s24 }
 0x164   : > { %736 = vrot.lane.b32.xlu2 %v729_v33, %s2258_s24 }
 0x16c   : > { %701 = vrot.lane.b32.xlu2 %v695_v36, %s2258_s24 }
 0x1ae   : > { %v704_v57 = vpop.permute.xlu1 %703 }
 0x1af   : > { %v711_v59 = vadd.f32 %v704_v57, %v681_v58 }
 0x1b6   : > { %v739_v44 = vpop.permute.xlu2 %738 }
 0x1b7   : > { %v745_v45 = vadd.f32 %v739_v44, %v727_v43 }
 0x1b9   : > { %765 = vrot.lane.b32.xlu2 %v745_v45, %s2258_s24 }
 0x1be   : > { %v735_v50 = vpop.permute.xlu0 %734  ;;  %v737_v51 = vpop.permute.xlu2 %736 }
 0x1bf   : > { %v743_v52 = vadd.f32 %v735_v50, %v725_v47  ;;  %v744_v53 = vadd.f32 %v737_v51, %v726_v49 }
 0x1c1   : > { %763 = vrot.lane.b32.xlu1 %v744_v53, %s2258_s24  ;;  %933 = vrot.lane.b32.xlu2 %v745_v45, %s2259_s27 }
 0x1c2   : > { %761 = vrot.lane.b32.xlu0 %v743_v52, %s2258_s24  ;;  %s2262_s24 = smov 16  }
 0x1c6   : > { %v702_v55 = vpop.permute.xlu2 %701  ;;  %v706_v48 = vpop.permute.xlu0 %705 }
 0x1c7   : > { %v710_v56 = vadd.f32 %v702_v55, %v680_v54  ;;  %v712_v61 = vadd.f32 %v706_v48, %v682_v60 }
 0x1c9   : > { %931 = vrot.lane.b32.xlu1 %v744_v53, %s2259_s27  ;;  %923 = vrot.lane.b32.xlu2 %v710_v56, %s2260_s28 }
 0x1ca   : > { %929 = vrot.lane.b32.xlu0 %v743_v52, %s2259_s27 }
 0x1d1   : > { %1108 = vrot.lane.b32.xlu1 %v745_v45, %s2261_s16  ;;  %925 = vrot.lane.b32.xlu2 %v711_v59, %s2260_s28 }
 0x1d2   : > { %1106 = vrot.lane.b32.xlu0 %v744_v53, %s2261_s16 }
 0x1d9   : > { %1104 = vrot.lane.b32.xlu1 %v743_v52, %s2261_s16  ;;  %1280 = vrot.lane.b32.xlu2 %v745_v45, %s2262_s24 }
 0x1da   : > { %1098 = vrot.lane.b32.xlu0 %v710_v56, %s2263_s29 }
 0x1e1   : > { %927 = vrot.lane.b32.xlu1 %v712_v61, %s2260_s28  ;;  %1100 = vrot.lane.b32.xlu2 %v711_v59, %s2263_s29 }
 0x1e2   : > { %1278 = vrot.lane.b32.xlu0 %v744_v53, %s2262_s24 }
 0x1e9   : > { %1276 = vrot.lane.b32.xlu1 %v743_v52, %s2262_s24  ;;  %1102 = vrot.lane.b32.xlu2 %v712_v61, %s2263_s29 }
 0x1ea   : > { %1270 = vrot.lane.b32.xlu0 %v710_v56, %s2264_s12 }
 0x1f1   : > { %1272 = vrot.lane.b32.xlu1 %v711_v59, %s2264_s12 }
 0x1f2   : > { %1274 = vrot.lane.b32.xlu0 %v712_v61, %s2264_s12 }
 0x1fa   : > { %2117 = vrot.lane.b32.xlu0 %v2532_v62, %s2260_s28 }
 0x213   : > { %v766_v63 = vpop.permute.xlu2 %765 }
 0x214   : > { %2004 = vmatpush.xpose.msk.msra.mxu3 %vm767_vm12, %v766_v63 }
 0x21b   : > { %v934_v0 = vpop.permute.xlu2 %933 }
 0x21c   : > { %2013 = vmatpush.xpose.msk.msrb.mxu0 %vm767_vm12, %v934_v0 }
 0x223   : > { %v924_v1 = vpop.permute.xlu2 %923 }
 0x22b   : > { %v926_v6 = vpop.permute.xlu2 %925 }
 0x233   : > { %v764_v2 = vpop.permute.xlu1 %763  ;;  %v1281_v10 = vpop.permute.xlu2 %1280 }
 0x234   : > { %v762_v5 = vpop.permute.xlu0 %761  ;;  %2005 = vmatpush.xpose.msk.msra.mxu3 %vm767_vm12, %v764_v2 }
 0x238   : > { %2006 = vmatpush.xpose.msk.msra.mxu3 %vm767_vm12, %v762_v5 }
 0x23b   : > { %2007 = vmatmul.msk.f32.vlgmr.msra.gmra.mxu3 %vm767_vm12, %v710_v56  ;;  %v932_v8 = vpop.permute.xlu1 %931  ;;  %v1101_v16 = vpop.permute.xlu2 %1100 }
 0x23c   : > { %910 = vmatpush.msrb.mxu3 %v2495_v25  ;;  %v930_v9 = vpop.permute.xlu0 %929  ;;  %2014 = vmatpush.xpose.msk.msrb.mxu0 %vm767_vm12, %v932_v8 }
 0x23e   : > { %911 = vmatpush.msrb.mxu3 %v2491_v23  ;;  %v746_v23 = vlaneseq }
 0x240   : > { %912 = vmatpush.msrb.mxu3 %v2503_v34  ;;  %2015 = vmatpush.xpose.msk.msrb.mxu0 %vm767_vm12, %v930_v9  ;;  %v747_v24 = vshrl.u32 %v746_v23, 7  ;;  %v751_v25 = vand.u32 127, %v746_v23 }
 0x242   : > { %vm752_vm13 = vcmp.le.s32.totalorder %v751_v25, %v747_v24  ;;  %v748_v30 = vadd.s32 8, %v747_v24  ;;  %v749_v55 = vadd.s32 16, %v747_v24 }
 0x243   : > { %2008 = vmatmul.msk.f32.gmra.mxu3 %vm767_vm12, %v711_v59  ;;  %2016 = vmatmul.msk.f32.vlgmr.msrb.gmra.mxu0 %vm767_vm12, %v924_v1  ;;  %v1109_v11 = vpop.permute.xlu1 %1108  ;;  %v1103_v20 = vpop.permute.xlu2 %1102  ;;  %v755_v28 = vsel %vm752_vm13, 0.0, %v2265_v27 }
 0x244   : > { %2031 = vmatpush.xpose.msk.msra.mxu0 %vm767_vm12, %v1281_v10  ;;  %v1107_v12 = vpop.permute.xlu0 %1106  ;;  %2022 = vmatpush.xpose.msk.msra.mxu2 %vm767_vm12, %v1109_v11  ;;  %vm753_vm15 = vcmp.le.s32.totalorder %v751_v25, %v748_v30  ;;  %vm754_vm0 = vcmp.le.s32.totalorder %v751_v25, %v749_v55 }
 0x245   : > { %v756_v40 = vsel %vm753_vm15, 0.0, %v2265_v27  ;;  %v757_v60 = vsel %vm754_vm0, 0.0, %v2265_v27 }
 0x248   : > { %2023 = vmatpush.xpose.msk.msra.mxu2 %vm767_vm12, %v1107_v12 }
 0x24b   : > { %2009 = vmatmul.msk.f32.gmra.mxu3 %vm767_vm12, %v712_v61  ;;  %2017 = vmatmul.msk.f32.gmra.mxu0 %vm767_vm12, %v926_v6  ;;  %v1105_v13 = vpop.permute.xlu1 %1104 }
 0x24c   : > { %v1099_v14 = vpop.permute.xlu0 %1098  ;;  %2024 = vmatpush.xpose.msk.msra.mxu2 %vm767_vm12, %v1105_v13 }
 0x24f   : > { %2025 = vmatmul.msk.f32.vlgmr.msra.gmra.mxu2 %vm767_vm12, %v1099_v14 }
 0x253   : > { %v928_v15 = vpop.permute.xlu1 %927 }
 0x254   : > { %v1279_v17 = vpop.permute.xlu0 %1278  ;;  %2018 = vmatmul.msk.f32.gmra.mxu0 %vm767_vm12, %v928_v15 }
 0x255   : > { %2032 = vmatpush.xpose.msk.msra.mxu0 %vm767_vm12, %v1279_v17 }
 0x257   : > { %2026 = vmatmul.msk.f32.gmra.mxu2 %vm767_vm12, %v1101_v16 }
 0x25b   : > { %v1277_v18 = vpop.permute.xlu1 %1276 }
 0x25c   : > { %v1271_v19 = vpop.permute.xlu0 %1270  ;;  %2033 = vmatpush.xpose.msk.msra.mxu0 %vm767_vm12, %v1277_v18 }
 0x25f   : > { %2027 = vmatmul.msk.f32.gmra.mxu2 %vm767_vm12, %v1103_v20  ;;  %2034 = vmatmul.msk.f32.vlgmr.msra.gmra.mxu0 %vm767_vm12, %v1271_v19 }
 0x263   : > { %v1273_v4 = vpop.permute.xlu1 %1272 }
 0x264   : > { %v1275_v3 = vpop.permute.xlu0 %1274 }
 0x267   : > { %2035 = vmatmul.msk.f32.gmra.mxu0 %vm767_vm12, %v1273_v4 }
 0x26c   : > { %v2118_v21 = vpop.permute.xlu0 %2117 }
 0x26d   : > { %v2119_v22 = vunpack.i.l.bf16 %v2118_v21  ;;  %v2120_v7 = vunpack.i.h.bf16 %v2118_v21 }
 0x26f   : > { %1085 = vmatpush.msrb.mxu1 %v2119_v22  ;;  %2036 = vmatmul.msk.f32.gmra.mxu0 %vm767_vm12, %v1275_v3 }
 0x271   : > { %1086 = vmatpush.msrb.mxu1 %v2120_v7 }
 0x2be   : > { %v800_v26 = vpop.f32.mrf.mxu3 }
 0x2bf   : > { %v809_v29 = vmul.f32 0.25, %v800_v26 }
 0x2c0   : > { %v964_v31 = vpop.f32.mrf.mxu0 }
 0x2c1   : > { %v973_v32 = vmul.f32 0.25, %v964_v31  ;;  %v2563_v33 = vadd.f32 %v809_v29, %v755_v28 }
 0x2c3   : > { %v816_v35 = vsel %vm815_vm14, %v2563_v33, -inf  ;;  %v2567_v36 = vadd.f32 %v973_v32, %v755_v28 }
 0x2c4   : > { %817 = vmax.xlane.f32.xlu2 %v816_v35 }
 0x2c5   : > { %v979_v38 = vsel %vm815_vm14, %v2567_v36, -inf }
 0x2c6   : > { %v803_v39 = vpop.f32.mrf.mxu3  ;;  %980 = vmax.xlane.f32.xlu1 %v979_v38 }
 0x2c7   : > { %v810_v41 = vmul.f32 0.25, %v803_v39 }
 0x2c8   : > { %v967_v43 = vpop.f32.mrf.mxu0 }
 0x2c9   : > { %v2571_v42 = vadd.f32 %v810_v41, %v756_v40  ;;  %v974_v50 = vmul.f32 0.25, %v967_v43 }
 0x2cb   : > { %v819_v44 = vsel %vm815_vm14, %v2571_v42, -inf  ;;  %v2579_v54 = vadd.f32 %v974_v50, %v756_v40 }
 0x2cc   : > { %820 = vmax.xlane.f32.xlu0 %v819_v44 }
 0x2cd   : > { %v982_v59 = vsel %vm815_vm14, %v2579_v54, -inf }
 0x2ce   : > { %v806_v8 = vpop.f32.mrf.mxu3 }
 0x2cf   : > { %v811_v9 = vmul.f32 0.25, %v806_v8 }
 0x2d1   : > { %v970_v47 = vpop.f32.mrf.mxu0  ;;  %v2599_v10 = vadd.f32 %v811_v9, %v757_v60 }
 0x2d2   : > { %v1139_v45 = vpop.f32.mrf.mxu2  ;;  %v975_v58 = vmul.f32 0.25, %v970_v47 }
 0x2d3   : > { %v1148_v46 = vmul.f32 0.25, %v1139_v45  ;;  %v822_v13 = vsel %vm815_vm14, %v2599_v10, -inf }
 0x2d4   : > { %v2589_v61 = vadd.f32 %v975_v58, %v757_v60 }
 0x2d5   : > { %v2575_v49 = vadd.f32 %v1148_v46, %v755_v28 }
 0x2d6   : > { %v985_v0 = vsel %vm815_vm14, %v2589_v61, -inf }
 0x2d7   : > { %v1154_v51 = vsel %vm815_vm14, %v2575_v49, -inf }
 0x2d8   : > { %1155 = vmax.xlane.f32.xlu2 %v1154_v51 }
 0x2da   : > { %v1142_v52 = vpop.f32.mrf.mxu2 }
 0x2db   : > { %v1149_v53 = vmul.f32 0.25, %v1142_v52 }
 0x2dc   : > { %v1311_v56 = vpop.f32.mrf.mxu0 }
 0x2dd   : > { %v2581_v57 = vadd.f32 %v1149_v53, %v756_v40  ;;  %v1320_v15 = vmul.f32 0.25, %v1311_v56 }
 0x2df   : > { %2122 = vrot.lane.b32.xlu1 %v2532_v62, %s2263_s29  ;;  %v1157_v48 = vsel %vm815_vm14, %v2581_v57, -inf  ;;  %v2607_v17 = vadd.f32 %v1320_v15, %v755_v28 }
 0x2e0   : > { %983 = vmax.xlane.f32.xlu2 %v982_v59  ;;  %1158 = vmax.xlane.f32.xlu0 %v1157_v48 }
 0x2e1   : > { %v1326_v19 = vsel %vm815_vm14, %v2607_v17, -inf }
 0x2e2   : > { %v1145_v11 = vpop.f32.mrf.mxu2 }
 0x2e3   : > { %v1150_v12 = vmul.f32 0.25, %v1145_v11 }
 0x2e4   : > { %v1314_v63 = vpop.f32.mrf.mxu0 }
 0x2e5   : > { %v2603_v14 = vadd.f32 %v1150_v12, %v757_v60  ;;  %v1321_v18 = vmul.f32 0.25, %v1314_v63 }
 0x2e7   : > { %v1160_v16 = vsel %vm815_vm14, %v2603_v14, -inf  ;;  %v2611_v20 = vadd.f32 %v1321_v18, %v756_v40 }
 0x2e8   : > { %986 = vmax.xlane.f32.xlu0 %v985_v0 }
 0x2e9   : > { %v1329_v3 = vsel %vm815_vm14, %v2611_v20, -inf }
 0x2ec   : > { %v1317_v1 = vpop.f32.mrf.mxu0 }
 0x2ed   : > { %v1322_v2 = vmul.f32 0.25, %v1317_v1 }
 0x2ef   : > { %v2593_v5 = vadd.f32 %v1322_v2, %v757_v60 }
 0x2f1   : > { %v1332_v6 = vsel %vm815_vm14, %v2593_v5, -inf }
 0x2f2   : > { %1333 = vmax.xlane.f32.xlu0 %v1332_v6 }
 0x2f8   : > { %1054 = vrot.lane.b32.xlu2 %v2503_v34, %s2260_s28 }
 0x309   : > { %823 = vmax.xlane.f32.xlu1 %v822_v13 }
 0x311   : > { %1161 = vmax.xlane.f32.xlu1 %v1160_v16 }
 0x319   : > { %1327 = vmax.xlane.f32.xlu1 %v1326_v19 }
 0x321   : > { %1330 = vmax.xlane.f32.xlu2 %v1329_v3 }
 0x337   : > { %v818_v4 = vpop.xlane.xlu2 %817 }
 0x338   : > { %v825_v21 = vsub.f32 %v2563_v33, %v818_v4 }
 0x339   : > { %v981_v22 = vpop.xlane.xlu1 %980 }
 0x33a   : > { %v828_v7 = vmul.f32 1.442695, %v825_v21  ;;  %v988_v23 = vsub.f32 %v2567_v36, %v981_v22 }
 0x33c   : > { %2141 = vpow2.f32 %v828_v7  ;;  %v991_v24 = vmul.f32 1.442695, %v988_v23 }
 0x33e   : > { %2143 = vpow2.f32 %v991_v24 }
 0x33f   : > { %v821_v25 = vpop.xlane.xlu0 %820 }
 0x340   : > { %v826_v26 = vsub.f32 %v2571_v42, %v821_v25 }
 0x342   : > { %v2618_v27 = vpop.eup %2141  ;;  %v830_v28 = vmul.f32 1.442695, %v826_v26 }
 0x343   : > { %v834_v29 = vsel %vm815_vm14, %v2618_v27, 0.0 }
 0x344   : > { %v2622_v30 = vpop.eup %2143  ;;  %2145 = vpow2.f32 %v830_v28  ;;  %835 = vadd.xlane.f32.xlu2 %v834_v29 }
 0x345   : > { %v997_v31 = vsel %vm815_vm14, %v2622_v30, 0.0 }
 0x346   : > { %998 = vadd.xlane.f32.xlu1 %v997_v31 }
 0x34a   : > { %v2626_v32 = vpop.eup %2145 }
 0x34b   : > { %v1156_v33 = vpop.xlane.xlu2 %1155  ;;  %v837_v35 = vsel %vm815_vm14, %v2626_v32, 0.0 }
 0x34c   : > { %v1163_v36 = vsub.f32 %v2575_v49, %v1156_v33  ;;  %838 = vadd.xlane.f32.xlu0 %v837_v35 }
 0x34e   : > { %v1166_v38 = vmul.f32 1.442695, %v1163_v36 }
 0x350   : > { %2147 = vpow2.f32 %v1166_v38 }
 0x351   : > { %v2123_v39 = vpop.permute.xlu1 %2122 }
 0x352   : > { %v2124_v40 = vunpack.i.l.bf16 %v2123_v39  ;;  %v2125_v43 = vunpack.i.h.bf16 %v2123_v39 }
 0x353   : > { %v984_v41 = vpop.xlane.xlu2 %983  ;;  %v1159_v42 = vpop.xlane.xlu0 %1158 }
 0x354   : > { %v989_v44 = vsub.f32 %v2579_v54, %v984_v41  ;;  %v1164_v45 = vsub.f32 %v2581_v57, %v1159_v42  ;;  %1257 = vmatpush.msra.mxu3 %v2124_v40 }
 0x356   : > { %v2633_v46 = vpop.eup %2147  ;;  %v993_v47 = vmul.f32 1.442695, %v989_v44  ;;  %v1168_v50 = vmul.f32 1.442695, %v1164_v45  ;;  %1258 = vmatpush.msra.mxu3 %v2125_v43 }
 0x357   : > { %v1172_v49 = vsel %vm815_vm14, %v2633_v46, 0.0 }
 0x358   : > { %2149 = vpow2.f32 %v993_v47  ;;  %1173 = vadd.xlane.f32.xlu1 %v1172_v49 }
 0x359   : > { %2151 = vpow2.f32 %v1168_v50 }
 0x35b   : > { %v1055_v51 = vpop.permute.xlu2 %1054  ;;  %v987_v52 = vpop.xlane.xlu0 %986 }
 0x35c   : > { %v990_v53 = vsub.f32 %v2589_v61, %v987_v52  ;;  %1087 = vmatpush.msrb.mxu1 %v1055_v51 }
 0x35e   : > { %v2638_v54 = vpop.eup %2149  ;;  %v995_v55 = vmul.f32 1.442695, %v990_v53 }
 0x35f   : > { %v2640_v56 = vpop.eup %2151  ;;  %v1000_v57 = vsel %vm815_vm14, %v2638_v54, 0.0 }
 0x360   : > { %2153 = vpow2.f32 %v995_v55  ;;  %1001 = vadd.xlane.f32.xlu2 %v1000_v57  ;;  %v1175_v58 = vsel %vm815_vm14, %v2640_v56, 0.0 }
 0x361   : > { %1176 = vadd.xlane.f32.xlu0 %v1175_v58 }
 0x365   : > { %v1334_v9 = vpop.xlane.xlu0 %1333 }
 0x366   : > { %v2646_v59 = vpop.eup %2153  ;;  %v1337_v12 = vsub.f32 %v2593_v5, %v1334_v9 }
 0x367   : > { %v1003_v48 = vsel %vm815_vm14, %v2646_v59, 0.0 }
 0x368   : > { %1004 = vadd.xlane.f32.xlu2 %v1003_v48  ;;  %v1342_v16 = vmul.f32 1.442695, %v1337_v12 }
 0x375   : > { %1226 = vrot.lane.b32.xlu0 %v2503_v34, %s2263_s29 }
 0x37c   : > { %v824_v60 = vpop.xlane.xlu1 %823 }
 0x37d   : > { %v827_v61 = vsub.f32 %v2599_v10, %v824_v60 }
 0x37f   : > { %v832_v63 = vmul.f32 1.442695, %v827_v61 }
 0x381   : > { %2155 = vpow2.f32 %v832_v63 }
 0x384   : > { %v1162_v0 = vpop.xlane.xlu1 %1161 }
 0x385   : > { %v1165_v1 = vsub.f32 %v2603_v14, %v1162_v0 }
 0x387   : > { %v2654_v2 = vpop.eup %2155  ;;  %v1170_v6 = vmul.f32 1.442695, %v1165_v1 }
 0x388   : > { %v840_v8 = vsel %vm815_vm14, %v2654_v2, 0.0 }
 0x389   : > { %2157 = vpow2.f32 %v1170_v6  ;;  %841 = vadd.xlane.f32.xlu1 %v840_v8 }
 0x38c   : > { %v1328_v11 = vpop.xlane.xlu1 %1327 }
 0x38d   : > { %v1335_v13 = vsub.f32 %v2607_v17, %v1328_v11 }
 0x38f   : > { %v2660_v10 = vpop.eup %2157  ;;  %v1338_v15 = vmul.f32 1.442695, %v1335_v13 }
 0x390   : > { %v1178_v14 = vsel %vm815_vm14, %v2660_v10, 0.0 }
 0x391   : > { %2159 = vpow2.f32 %v1338_v15  ;;  %1179 = vadd.xlane.f32.xlu1 %v1178_v14 }
 0x392   : > { %2161 = vpow2.f32 %v1342_v16 }
 0x394   : > { %v1331_v18 = vpop.xlane.xlu2 %1330 }
 0x395   : > { %v1336_v19 = vsub.f32 %v2611_v20, %v1331_v18 }
 0x397   : > { %v2665_v3 = vpop.eup %2159  ;;  %v1340_v4 = vmul.f32 1.442695, %v1336_v19 }
 0x398   : > { %v1344_v5 = vsel %vm815_vm14, %v2665_v3, 0.0  ;;  %v2669_v17 = vpop.eup %2161 }
 0x399   : > { %2163 = vpow2.f32 %v1340_v4  ;;  %1345 = vadd.xlane.f32.xlu1 %v1344_v5  ;;  %v1350_v21 = vsel %vm815_vm14, %v2669_v17, 0.0 }
 0x39f   : > { %v2673_v22 = vpop.eup %2163  ;;  %1351 = vadd.xlane.f32.xlu0 %v1350_v21 }
 0x3a0   : > { %v1347_v7 = vsel %vm815_vm14, %v2673_v22, 0.0 }
 0x3a1   : > { %1348 = vadd.xlane.f32.xlu2 %v1347_v7 }
 0x3b2   : > { %1398 = vrot.lane.b32.xlu1 %v2503_v34, %s2264_s12 }
 0x3b7   : > { %v836_v20 = vpop.xlane.xlu2 %835 }
 0x3b8   : > { %2165 = vrcp.f32 %v836_v20  ;;  %v852_v33 = vand.u32 2147483647, %v836_v20  ;;  %v854_v35 = vand.u32 2147483648, %v836_v20  ;;  %vm848_vm3 = vweird.f32 %v836_v20 }
 0x3b9   : > { %2127 = vrot.lane.b32.xlu2 %v2532_v62, %s2264_s12  ;;  %v999_v23 = vpop.xlane.xlu1 %998 }
 0x3ba   : > { %2167 = vrcp.f32 %v999_v23  ;;  %v1017_v34 = vand.u32 2147483648, %v999_v23  ;;  %v1015_v62 = vand.u32 2147483647, %v999_v23  ;;  %vm853_vm6 = vcmp.eq.f32.partialorder %v852_v33, 8.507059e+37 }
 0x3bb   : > { %v855_v42 = vor.u32 1.1754944e-38, %v854_v35  ;;  %vm1011_vm7 = vweird.f32 %v999_v23 }
 0x3bc   : > { %v1018_v47 = vor.u32 1.1754944e-38, %v1017_v34  ;;  %vm1016_vm9 = vcmp.eq.f32.partialorder %v1015_v62, 8.507059e+37 }
 0x3be   : > { %v2166_v24 = vpop.eup %2165 }
 0x3bf   : > { %v844_v25 = vmul.f32 %v2166_v24, %v836_v20  ;;  %v839_v26 = vpop.xlane.xlu0 %838  ;;  %vm849_vm2 = vweird.f32 %v2166_v24 }
 0x3c0   : > { %v2168_v28 = vpop.eup %2167  ;;  %2169 = vrcp.f32 %v839_v26  ;;  %vm850_vm5 = vmor %vm848_vm3, %vm849_vm2  ;;  %v869_v53 = vand.u32 2147483648, %v839_v26  ;;  %v867_v48 = vand.u32 2147483647, %v839_v26  ;;  %vm863_vm11 = vweird.f32 %v839_v26 }
 0x3c1   : > { %v845_v29 = vsub.f32 1.0, %v844_v25  ;;  %v1007_v31 = vmul.f32 %v2168_v28, %v999_v23  ;;  %vm1012_vm4 = vweird.f32 %v2168_v28 }
 0x3c2   : > { %vm1013_vm8 = vmor %vm1011_vm7, %vm1012_vm4  ;;  %v870_v61 = vor.u32 1.1754944e-38, %v869_v53  ;;  %vm868_vm15 = vcmp.eq.f32.partialorder %v867_v48, 8.507059e+37 }
 0x3c3   : > { %v846_v36 = vmul.f32 %v2166_v24, %v845_v29  ;;  %v1008_v38 = vsub.f32 1.0, %v1007_v31 }
 0x3c5   : > { %v847_v39 = vadd.f32 %v2166_v24, %v846_v36  ;;  %v1009_v40 = vmul.f32 %v2168_v28, %v1008_v38 }
 0x3c6   : > { %v2170_v41 = vpop.eup %2169 }
 0x3c7   : > { %v1010_v43 = vadd.f32 %v2168_v28, %v1009_v40  ;;  %v859_v44 = vmul.f32 %v2170_v41, %v839_v26  ;;  %v851_v45 = vsel %vm850_vm5, %v2166_v24, %v847_v39  ;;  %vm864_vm10 = vweird.f32 %v2170_v41 }
 0x3c8   : > { %v856_v50 = vsel %vm853_vm6, %v855_v42, %v851_v45  ;;  %vm865_vm13 = vmor %vm863_vm11, %vm864_vm10 }
 0x3c9   : > { %v860_v49 = vsub.f32 1.0, %v859_v44  ;;  %v857_v51 = vmul.f32 %v2618_v27, %v856_v50  ;;  %v1014_v52 = vsel %vm1013_vm8, %v2168_v28, %v1010_v43 }
 0x3ca   : > { %v1019_v55 = vsel %vm1016_vm9, %v1018_v47, %v1014_v52 }
 0x3cb   : > { %v861_v57 = vmul.f32 %v2170_v41, %v860_v49  ;;  %2010 = vmatmul.msk.f32.vlgmr.msrb.gmra.mxu3 %vm815_vm14, %v857_v51  ;;  %v1020_v58 = vmul.f32 %v2622_v30, %v1019_v55 }
 0x3cd   : > { %2019 = vmatmul.msk.f32.vlgmr.msrb.gmra.mxu1 %vm815_vm14, %v1020_v58  ;;  %v862_v60 = vadd.f32 %v2170_v41, %v861_v57 }
 0x3cf   : > { %v866_v63 = vsel %vm865_vm13, %v2170_v41, %v862_v60 }
 0x3d0   : > { %v871_v0 = vsel %vm868_vm15, %v870_v61, %v866_v63 }
 0x3d1   : > { %v872_v27 = vmul.f32 %v2626_v32, %v871_v0 }
 0x3d3   : > { %v1002_v1 = vpop.xlane.xlu2 %1001  ;;  %2011 = vmatmul.msk.f32.gmra.mxu3 %vm815_vm14, %v872_v27 }
 0x3d4   : > { %2171 = vrcp.f32 %v1002_v1  ;;  %v1032_v11 = vand.u32 2147483648, %v1002_v1  ;;  %v2687_v13 = vpop.xlane.xlu0 %1176  ;;  %v1030_v15 = vand.u32 2147483647, %v1002_v1  ;;  %vm1026_vm2 = vweird.f32 %v1002_v1 }
 0x3d6   : > { %v1033_v18 = vor.u32 1.1754944e-38, %v1032_v11  ;;  %vm1031_vm4 = vcmp.eq.f32.partialorder %v1030_v15, 8.507059e+37  ;;  %v1205_v15 = vand.u32 2147483647, %v2687_v13 }
 0x3da   : > { %v2172_v6 = vpop.eup %2171 }
 0x3db   : > { %v1022_v8 = vmul.f32 %v2172_v6, %v1002_v1  ;;  %v1005_v30 = vpop.xlane.xlu2 %1004  ;;  %vm1027_vm0 = vweird.f32 %v2172_v6 }
 0x3dc   : > { %2173 = vrcp.f32 %v1005_v30  ;;  %vm1028_vm3 = vmor %vm1026_vm2, %vm1027_vm0  ;;  %v1047_v7 = vand.u32 2147483648, %v1005_v30  ;;  %v1045_v24 = vand.u32 2147483647, %v1005_v30  ;;  %vm1041_vm6 = vweird.f32 %v1005_v30 }
 0x3dd   : > { %v1023_v9 = vsub.f32 1.0, %v1022_v8 }
 0x3de   : > { %v1048_v26 = vor.u32 1.1754944e-38, %v1047_v7  ;;  %vm1046_vm8 = vcmp.eq.f32.partialorder %v1045_v24, 8.507059e+37 }
 0x3df   : > { %v1024_v12 = vmul.f32 %v2172_v6, %v1023_v9  ;;  %v1207_v9 = vand.u32 2147483648, %v2687_v13 }
 0x3e1   : > { %v1025_v14 = vadd.f32 %v2172_v6, %v1024_v12 }
 0x3e2   : > { %v2174_v16 = vpop.eup %2173 }
 0x3e3   : > { %v1037_v32 = vmul.f32 %v2174_v16, %v1005_v30  ;;  %v1029_v19 = vsel %vm1028_vm3, %v2172_v6, %v1025_v14  ;;  %vm1042_vm5 = vweird.f32 %v2174_v16 }
 0x3e4   : > { %v1034_v4 = vsel %vm1031_vm4, %v1033_v18, %v1029_v19  ;;  %vm1043_vm7 = vmor %vm1041_vm6, %vm1042_vm5  ;;  %vm1201_vm5 = vweird.f32 %v2687_v13 }
 0x3e5   : > { %v1038_v5 = vsub.f32 1.0, %v1037_v32  ;;  %v1035_v21 = vmul.f32 %v2638_v54, %v1034_v4  ;;  %v1174_v54 = vpop.xlane.xlu1 %1173  ;;  %v1208_v32 = vor.u32 1.1754944e-38, %v1207_v9 }
 0x3e6   : > { %2175 = vrcp.f32 %v1174_v54  ;;  %v1192_v57 = vand.u32 2147483648, %v1174_v54  ;;  %vm1186_vm0 = vweird.f32 %v1174_v54  ;;  %v1190_v48 = vand.u32 2147483647, %v1174_v54 }
 0x3e7   : > { %v1039_v20 = vmul.f32 %v2174_v16, %v1038_v5  ;;  %v1227_v23 = vpop.permute.xlu0 %1226  ;;  %2020 = vmatmul.msk.f32.gmra.mxu1 %vm815_vm14, %v1035_v21 }
 0x3e8   : > { %1259 = vmatpush.msra.mxu3 %v1227_v23  ;;  %v1193_v27 = vor.u32 1.1754944e-38, %v1192_v57  ;;  %vm1191_vm3 = vcmp.eq.f32.partialorder %v1190_v48, 8.507059e+37 }
 0x3e9   : > { %v1040_v25 = vadd.f32 %v2174_v16, %v1039_v20 }
 0x3eb   : > { %v1044_v28 = vsel %vm1043_vm7, %v2174_v16, %v1040_v25  ;;  %vm1206_vm7 = vcmp.eq.f32.partialorder %v1205_v15, 8.507059e+37  ;;  %v1495_v15 = vld [vmem:[%s2378_s22 + $0x30] sm:$0xff] }
 0x3ec   : > { %v1049_v29 = vsel %vm1046_vm8, %v1048_v26, %v1044_v28  ;;  %v2176_v35 = vpop.eup %2175 }
 0x3ed   : > { %v1050_v31 = vmul.f32 %v2646_v59, %v1049_v29  ;;  %v1182_v36 = vmul.f32 %v2176_v35, %v1174_v54  ;;  %vm1187_vm13 = vweird.f32 %v2176_v35 }
 0x3ee   : > { %vm1188_vm2 = vmor %vm1186_vm0, %vm1187_vm13 }
 0x3ef   : > { %2021 = vmatmul.msk.f32.gmra.mxu1 %vm815_vm14, %v1050_v31  ;;  %v1183_v62 = vsub.f32 1.0, %v1182_v36 }
 0x3f1   : > { %v1184_v44 = vmul.f32 %v2176_v35, %v1183_v62 }
 0x3f3   : > { %v1185_v53 = vadd.f32 %v2176_v35, %v1184_v44 }
 0x3f5   : > { %v1189_v63 = vsel %vm1188_vm2, %v2176_v35, %v1185_v53 }
 0x3f6   : > { %v1194_v30 = vsel %vm1191_vm3, %v1193_v27, %v1189_v63 }
 0x3f7   : > { %v1195_v16 = vmul.f32 %v2633_v46, %v1194_v30 }
 0x3fc   : > { %v842_v33 = vpop.xlane.xlu1 %841 }
 0x3fd   : > { %2177 = vrcp.f32 %v842_v33  ;;  %v884_v43 = vand.u32 2147483648, %v842_v33  ;;  %v882_v45 = vand.u32 2147483647, %v842_v33  ;;  %vm878_vm10 = vweird.f32 %v842_v33 }
 0x3fe   : > { %2179 = vrcp.f32 %v2687_v13 }
 0x3ff   : > { %v885_v49 = vor.u32 1.1754944e-38, %v884_v43  ;;  %vm883_vm15 = vcmp.eq.f32.partialorder %v882_v45, 8.507059e+37 }
 0x403   : > { %v2178_v38 = vpop.eup %2177 }
 0x404   : > { %v2694_v34 = vpop.eup %2179  ;;  %v874_v39 = vmul.f32 %v2178_v38, %v842_v33  ;;  %v2696_v40 = vpop.xlane.xlu1 %1179  ;;  %vm879_vm9 = vweird.f32 %v2178_v38 }
 0x405   : > { %v1197_v59 = vmul.f32 %v2694_v34, %v2687_v13  ;;  %2181 = vrcp.f32 %v2696_v40  ;;  %vm880_vm11 = vmor %vm878_vm10, %vm879_vm9  ;;  %vm1202_vm4 = vweird.f32 %v2694_v34  ;;  %v1222_v31 = vand.u32 2147483648, %v2696_v40 }
 0x406   : > { %v875_v41 = vsub.f32 1.0, %v874_v39  ;;  %vm1203_vm6 = vmor %vm1201_vm5, %vm1202_vm4  ;;  %vm1216_vm13 = vweird.f32 %v2696_v40 }
 0x407   : > { %v1198_v50 = vsub.f32 1.0, %v1197_v59 }
 0x408   : > { %v876_v42 = vmul.f32 %v2178_v38, %v875_v41  ;;  %v1223_v41 = vor.u32 1.1754944e-38, %v1222_v31 }
 0x409   : > { %v1199_v60 = vmul.f32 %v2694_v34, %v1198_v50 }
 0x40a   : > { %v877_v47 = vadd.f32 %v2178_v38, %v876_v42 }
 0x40b   : > { %v2704_v55 = vpop.eup %2181  ;;  %v1200_v8 = vadd.f32 %v2694_v34, %v1199_v60 }
 0x40c   : > { %v2701_v51 = vpop.xlane.xlu1 %1345  ;;  %v881_v52 = vsel %vm880_vm11, %v2178_v38, %v877_v47  ;;  %v1212_v0 = vmul.f32 %v2704_v55, %v2696_v40  ;;  %vm1217_vm11 = vweird.f32 %v2704_v55 }
 0x40d   : > { %2183 = vrcp.f32 %v2701_v51  ;;  %v886_v58 = vsel %vm883_vm15, %v885_v49, %v881_v52  ;;  %v1204_v18 = vsel %vm1203_vm6, %v2694_v34, %v1200_v8  ;;  %v1364_v13 = vand.u32 2147483648, %v2701_v51  ;;  %vm1218_vm0 = vmor %vm1216_vm13, %vm1217_vm11 }
 0x40e   : > { %v887_v61 = vmul.f32 %v2654_v2, %v886_v58  ;;  %v1213_v12 = vsub.f32 1.0, %v1212_v0  ;;  %v1209_v7 = vsel %vm1206_vm7, %v1208_v32, %v1204_v18  ;;  %vm1358_vm9 = vweird.f32 %v2701_v51  ;;  %v1492_v18 = vld [vmem:[%s2378_s22 + $0x18] sm:$0xff]  ;;  %v1491_v32 = vld [vmem:[%s2378_s22 + $0x10] sm:$0xff] }
 0x40f   : > { %v1362_v46 = vand.u32 2147483647, %v2701_v51  ;;  %v1210_v28 = vmul.f32 %v2640_v56, %v1209_v7  ;;  %v1365_v36 = vor.u32 1.1754944e-38, %v1364_v13  ;;  %v1220_v56 = vand.u32 2147483647, %v2696_v40 }
 0x410   : > { %2012 = vmatmul.msk.f32.gmra.mxu3 %vm815_vm14, %v887_v61  ;;  %v1214_v4 = vmul.f32 %v2704_v55, %v1213_v12  ;;  %v1496_v12 = vld [vmem:[%s2378_s22 + $0x38] sm:$0xff]  ;;  %vm1485_vm11 = vcmask 392192  }
 0x411   : > { %vm1363_vm15 = vcmp.eq.f32.partialorder %v1362_v46, 8.507059e+37  ;;  %vm1221_vm3 = vcmp.eq.f32.partialorder %v1220_v56, 8.507059e+37  ;;  %1514 = vmatpush.msrb.mxu2 %v1496_v12 }
 0x412   : > { %v2711_v1 = vpop.xlane.xlu0 %1351  ;;  %v1215_v29 = vadd.f32 %v2704_v55, %v1214_v4  ;;  %v1489_v4 = vld [vmem:[%s2378_s22] sm:$0xff] }
 0x413   : > { %v2184_v6 = vpop.eup %2183  ;;  %2185 = vrcp.f32 %v2711_v1  ;;  %v1392_v58 = vand.u32 2147483647, %v2711_v1  ;;  %1515 = vmatpush.msrb.mxu2 %v1495_v15 }
 0x414   : > { %v1354_v2 = vmul.f32 %v2184_v6, %v2701_v51  ;;  %v2718_v11 = vpop.xlane.xlu2 %1348  ;;  %vm1359_vm8 = vweird.f32 %v2184_v6  ;;  %v1219_v62 = vsel %vm1218_vm0, %v2704_v55, %v1215_v29 }
 0x415   : > { %2187 = vrcp.f32 %v2718_v11  ;;  %vm2733_vm10 = vmor %vm1358_vm9, %vm1359_vm8  ;;  %v1379_v43 = vand.u32 2147483648, %v2718_v11  ;;  %vm1373_vm4 = vweird.f32 %v2718_v11  ;;  %v1224_v45 = vsel %vm1221_vm3, %v1223_v41, %v1219_v62 }
 0x416   : > { %v1355_v14 = vsub.f32 1.0, %v1354_v2  ;;  %v1377_v47 = vand.u32 2147483647, %v2718_v11  ;;  %v1225_v52 = vmul.f32 %v2660_v10, %v1224_v45  ;;  %vm1388_vm8 = vweird.f32 %v2711_v1 }
 0x417   : > { %v1380_v51 = vor.u32 1.1754944e-38, %v1379_v43 }
 0x418   : > { %v1356_v19 = vmul.f32 %v2184_v6, %v1355_v14  ;;  %2028 = vmatmul.msk.f32.vlgmr.msra.gmra.mxu3 %vm815_vm14, %v1195_v16  ;;  %vm1378_vm6 = vcmp.eq.f32.partialorder %v1377_v47, 8.507059e+37  ;;  %v1494_v14 = vld [vmem:[%s2378_s22 + $0x28] sm:$0xff]  ;;  %v1493_v16 = vld [vmem:[%s2378_s22 + $0x20] sm:$0xff]  ;;  %v2209_v47 = vld [vmem:[#allocation2 + $0x10] sm:$0xff] }
 0x419   : > { %v2727_v5 = vpop.eup %2185  ;;  %1516 = vmatpush.msrb.mxu2 %v1494_v14 }
 0x41a   : > { %v1357_v21 = vadd.f32 %v2184_v6, %v1356_v19  ;;  %v1384_v33 = vmul.f32 %v2727_v5, %v2711_v1  ;;  %vm1389_vm7 = vweird.f32 %v2727_v5  ;;  %v1490_v19 = vld [vmem:[%s2378_s22 + $0x8] sm:$0xff] }
 0x41b   : > { %v2188_v20 = vpop.eup %2187  ;;  %vm1390_vm9 = vmor %vm1388_vm8, %vm1389_vm7  ;;  %1517 = vmatpush.msrb.mxu2 %v1493_v16 }
 0x41c   : > { %v1369_v23 = vmul.f32 %v2188_v20, %v2718_v11  ;;  %v2128_v24 = vpop.permute.xlu2 %2127  ;;  %v1361_v54 = vsel %vm2733_vm10, %v2184_v6, %v1357_v21  ;;  %v1385_v59 = vsub.f32 1.0, %v1384_v33  ;;  %vm1374_vm2 = vweird.f32 %v2188_v20 }
 0x41d   : > { %v2129_v26 = vunpack.i.l.bf16 %v2128_v24  ;;  %v2130_v38 = vunpack.i.h.bf16 %v2128_v24  ;;  %v1366_v39 = vsel %vm1363_vm15, %v1365_v36, %v1361_v54  ;;  %vm1375_vm5 = vmor %vm1373_vm4, %vm1374_vm2  ;;  %vm1393_vm10 = vcmp.eq.f32.partialorder %v1392_v58, 8.507059e+37  ;;  %1518 = vmatpush.msrb.mxu2 %v1492_v18  ;;  %v1604_v58 = vld [vmem:[%s2389_s11 + $0x58] sm:$0xff] }
 0x41e   : > { %v1370_v35 = vsub.f32 1.0, %v1369_v23  ;;  %v1367_v40 = vmul.f32 %v2665_v3, %v1366_v39  ;;  %v1386_v50 = vmul.f32 %v2727_v5, %v1385_v59  ;;  %v1394_v3 = vand.u32 2147483648, %v2711_v1 }
 0x41f   : > { %1429 = vmatpush.msra.mxu1 %v2129_v26  ;;  %1519 = vmatpush.msrb.mxu2 %v1491_v32 }
 0x420   : > { %v1371_v34 = vmul.f32 %v2188_v20, %v1370_v35  ;;  %2029 = vmatmul.msk.f32.gmra.mxu3 %vm815_vm14, %v1210_v28  ;;  %v1387_v55 = vadd.f32 %v2727_v5, %v1386_v50  ;;  %v1395_v48 = vor.u32 1.1754944e-38, %v1394_v3  ;;  %v1606_v3 = vld [vmem:[%s2389_s11 + $0x68] sm:$0xff] }
 0x421   : > { %1430 = vmatpush.msra.mxu1 %v2130_v38  ;;  %1520 = vmatpush.msrb.mxu2 %v1490_v19 }
 0x422   : > { %v1372_v42 = vadd.f32 %v2188_v20, %v1371_v34  ;;  %v1391_v10 = vsel %vm1390_vm9, %v2727_v5, %v1387_v55  ;;  %v2207_v34 = vld [vmem:[#allocation2] sm:$0xff] }
 0x423   : > { %v1396_v60 = vsel %vm1393_vm10, %v1395_v48, %v1391_v10  ;;  %1521 = vmatpush.msrb.mxu2 %v1489_v4  ;;  %v1605_v55 = vld [vmem:[%s2389_s11 + $0x60] sm:$0xff]  ;;  %v1602_v48 = vld [vmem:[%s2389_s11 + $0x48] sm:$0xff] }
 0x424   : > { %v1399_v44 = vpop.permute.xlu1 %1398  ;;  %v1376_v49 = vsel %vm1375_vm5, %v2188_v20, %v1372_v42  ;;  %v1397_v61 = vmul.f32 %v2669_v17, %v1396_v60  ;;  %v2208_v42 = vld [vmem:[#allocation2 + $0x8] sm:$0xff]  ;;  %v1601_v10 = vld [vmem:[%s2389_s11 + $0x40] sm:$0xff]  ;;  %v1599_v60 = vld [vmem:[%s2389_s11 + $0x30] sm:$0xff] }
 0x425   : > { %1431 = vmatpush.msra.mxu1 %v1399_v44  ;;  %v1381_v53 = vsel %vm1378_vm6, %v1380_v51, %v1376_v49 }
 0x426   : > { %2037 = vmatmul.msk.f32.vlgmr.msra.gmra.mxu1 %vm815_vm14, %v1367_v40  ;;  %v1382_v57 = vmul.f32 %v2673_v22, %v1381_v53  ;;  %v1608_v53 = vld [vmem:[%s2389_s11 + $0x78] sm:$0xff] }
 0x427   : > { %1652 = vmatpush.msrb.mxu0 %v1608_v53  ;;  %v1740_v53 = vld [vmem:[%s2394_s19 + $0x38] sm:$0xff] }
 0x428   : > { %2030 = vmatmul.msk.f32.gmra.mxu3 %vm815_vm14, %v1225_v52  ;;  %v1607_v52 = vld [vmem:[%s2389_s11 + $0x70] sm:$0xff] }
 0x429   : > { %1626 = vmatpush.msrb.mxu3 %v1607_v52  ;;  %1653 = vmatpush.msrb.mxu0 %v1606_v3  ;;  %v1741_v52 = vld [vmem:[%s2394_s19 + $0x40] sm:$0xff]  ;;  %v1738_v3 = vld [vmem:[%s2394_s19 + $0x28] sm:$0xff] }
 0x42b   : > { %1627 = vmatpush.msrb.mxu3 %v1605_v55  ;;  %1654 = vmatpush.msrb.mxu0 %v1604_v58  ;;  %v1739_v55 = vld [vmem:[%s2394_s19 + $0x30] sm:$0xff]  ;;  %v1736_v58 = vld [vmem:[%s2394_s19 + $0x18] sm:$0xff] }
 0x42d   : > { %1655 = vmatpush.msrb.mxu0 %v1602_v48 }
 0x42e   : > { %2038 = vmatmul.msk.f32.gmra.mxu1 %vm815_vm14, %v1382_v57  ;;  %v1603_v57 = vld [vmem:[%s2389_s11 + $0x50] sm:$0xff] }
 0x42f   : > { %1628 = vmatpush.msrb.mxu3 %v1603_v57  ;;  %v1737_v57 = vld [vmem:[%s2394_s19 + $0x20] sm:$0xff] }
 0x431   : > { %1629 = vmatpush.msrb.mxu3 %v1601_v10  ;;  %v1735_v10 = vld [vmem:[%s2394_s19 + $0x10] sm:$0xff] }
 0x433   : > { %1630 = vmatpush.msrb.mxu3 %v1599_v60  ;;  %v1734_v60 = vld [vmem:[%s2394_s19 + $0x8] sm:$0xff] }
 0x436   : > { %2039 = vmatmul.msk.f32.gmra.mxu1 %vm815_vm14, %v1397_v61  ;;  %vm1481_vm14 = vcmask 261120   ;;  %v1600_v61 = vld [vmem:[%s2389_s11 + $0x38] sm:$0xff] }
 0x437   : > { %1656 = vmatpush.msrb.mxu0 %v1600_v61 }
 0x44a   : > { %v1089_v63 = vpop.f32.mrf.mxu1 }
 0x44b   : > { %1445 = vrot.lane.b32.xlu2 %v1089_v63, %s2262_s24  ;;  %v1597_v63 = vld [vmem:[%s2389_s11 + $0x20] sm:$0xff] }
 0x44c   : > { %1631 = vmatpush.msrb.mxu3 %v1597_v63  ;;  %v1733_v63 = vld [vmem:[%s2394_s19] sm:$0xff] }
 0x44e   : > { %v914_v0 = vpop.f32.mrf.mxu3 }
 0x456   : > { %v917_v27 = vpop.f32.mrf.mxu3 }
 0x464   : > { %v1092_v22 = vpop.f32.mrf.mxu1 }
 0x46c   : > { %v1095_v1 = vpop.f32.mrf.mxu1 }
 0x493   : > { %v920_v6 = vpop.f32.mrf.mxu3 }
 0x49b   : > { %v1261_v8 = vpop.f32.mrf.mxu3 }
 0x49c   : > { %1457 = vrot.lane.b32.xlu2 %v1261_v8, %s2261_s16 }
 0x4a3   : > { %v1433_v30 = vpop.f32.mrf.mxu1  ;;  %v1264_v17 = vpop.f32.mrf.mxu3 }
 0x4a4   : > { %1469 = vrot.lane.b32.xlu1 %v1433_v30, %s2259_s27  ;;  %1447 = vrot.lane.b32.xlu2 %v1092_v22, %s2262_s24  ;;  %v1596_v22 = vld [vmem:[%s2389_s11 + $0x18] sm:$0xff] }
 0x4a5   : > { %v1446_v5 = vpop.permute.xlu2 %1445 }
 0x4a6   : > { %v1478_v20 = vsel %vm767_vm12, %v914_v0, %v1446_v5  ;;  %v1598_v0 = vld [vmem:[%s2389_s11 + $0x28] sm:$0xff] }
 0x4a7   : > { %1657 = vmatpush.msrb.mxu0 %v1598_v0 }
 0x4a9   : > { %1658 = vmatpush.msrb.mxu0 %v1596_v22 }
 0x4ab   : > { %v1436_v9 = vpop.f32.mrf.mxu1  ;;  %v1267_v2 = vpop.f32.mrf.mxu3 }
 0x4ac   : > { %1471 = vrot.lane.b32.xlu0 %v1436_v9, %s2259_s27  ;;  %1459 = vrot.lane.b32.xlu1 %v1264_v17, %s2261_s16 }
 0x4ad   : > { %1449 = vrot.lane.b32.xlu2 %v1095_v1, %s2262_s24  ;;  %v1594_v1 = vld [vmem:[%s2389_s11 + $0x8] sm:$0xff] }
 0x4ae   : > { %1659 = vmatpush.msrb.mxu0 %v1594_v1 }
 0x4b3   : > { %v1439_v11 = vpop.f32.mrf.mxu1 }
 0x4b4   : > { %1461 = vrot.lane.b32.xlu1 %v1267_v2, %s2261_s16 }
 0x4b5   : > { %1473 = vrot.lane.b32.xlu2 %v1439_v11, %s2259_s27 }
 0x4f6   : > { %v1458_v21 = vpop.permute.xlu2 %1457 }
 0x4f7   : > { %v1482_v13 = vsel %vm1481_vm14, %v1478_v20, %v1458_v21 }
 0x4fe   : > { %v1448_v7 = vpop.permute.xlu2 %1447 }
 0x4ff   : > { %v1479_v25 = vsel %vm767_vm12, %v917_v27, %v1448_v7  ;;  %v1595_v27 = vld [vmem:[%s2389_s11 + $0x10] sm:$0xff]  ;;  %v2132_v7 = vld [vmem:[%s2925_s14] ss:$0 sm:$0xff] }
 0x500   : > { %1632 = vmatpush.msrb.mxu3 %v1595_v27 }
 0x507   : > { %v1450_v24 = vpop.permute.xlu2 %1449 }
 0x508   : > { %v1480_v54 = vsel %vm767_vm12, %v920_v6, %v1450_v24  ;;  %v1593_v6 = vld [vmem:[%s2389_s11] sm:$0xff] }
 0x509   : > { %1633 = vmatpush.msrb.mxu3 %v1593_v6 }
 0x50f   : > { %v1474_v35 = vpop.permute.xlu2 %1473 }
 0x516   : > { %v1470_v46 = vpop.permute.xlu1 %1469 }
 0x517   : > { %v1486_v23 = vsel %vm1485_vm11, %v1482_v13, %v1470_v46 }
 0x518   : > { %2040 = vmatmul.msk.f32.vlgmr.msrb.gmra.mxu2 %vm501_vm1, %v1486_v23 }
 0x51e   : > { %v1472_v26 = vpop.permute.xlu0 %1471  ;;  %v1460_v28 = vpop.permute.xlu1 %1459 }
 0x51f   : > { %v1483_v29 = vsel %vm1481_vm14, %v1479_v25, %v1460_v28 }
 0x520   : > { %v1487_v31 = vsel %vm1485_vm11, %v1483_v29, %v1472_v26 }
 0x521   : > { %2041 = vmatmul.msk.f32.gmra.mxu2 %vm501_vm1, %v1487_v31 }
 0x526   : > { %v1462_v33 = vpop.permute.xlu1 %1461 }
 0x527   : > { %v1484_v36 = vsel %vm1481_vm14, %v1480_v54, %v1462_v33 }
 0x528   : > { %v1488_v38 = vsel %vm1485_vm11, %v1484_v36, %v1474_v35 }
 0x529   : > { %2042 = vmatmul.msk.f32.gmra.mxu2 %vm501_vm1, %v1488_v38 }
 0x59b   : > { %v1523_v56 = vpop.f32.mrf.mxu2 }
 0x59c   : > { %v2796_v39 = vadd.f32 %v2207_v34, %v1523_v56 }
 0x59e   : > { %v1536_v62 = vmul.f32 %v2796_v39, %v2796_v39 }
 0x5a0   : > { %v1539_v41 = vsel %vm501_vm1, %v1536_v62, 0.0 }
 0x5a1   : > { %1540 = vadd.xlane.f32.xlu1 %v1539_v41 }
 0x5a4   : > { %v1526_v59 = vpop.f32.mrf.mxu2 }
 0x5a5   : > { %v2801_v43 = vadd.f32 %v2208_v42, %v1526_v59  ;;  %v1748_v42 = vld [vmem:[%s2394_s19 + $0x78] sm:$0xff] }
 0x5a6   : > { %1749 = vmatpush.msrb.mxu1 %v1748_v42 }
 0x5a7   : > { %v1537_v44 = vmul.f32 %v2801_v43, %v2801_v43 }
 0x5a9   : > { %v1542_v40 = vsel %vm501_vm1, %v1537_v44, 0.0  ;;  %v1747_v44 = vld [vmem:[%s2394_s19 + $0x70] sm:$0xff] }
 0x5aa   : > { %1543 = vadd.xlane.f32.xlu2 %v1542_v40  ;;  %1750 = vmatpush.msrb.mxu1 %v1747_v44  ;;  %v1746_v40 = vld [vmem:[%s2394_s19 + $0x68] sm:$0xff] }
 0x5ac   : > { %v1529_v45 = vpop.f32.mrf.mxu2  ;;  %1751 = vmatpush.msrb.mxu1 %v1746_v40 }
 0x5ad   : > { %v2806_v50 = vadd.f32 %v2209_v47, %v1529_v45  ;;  %v1745_v45 = vld [vmem:[%s2394_s19 + $0x60] sm:$0xff]  ;;  %v1744_v47 = vld [vmem:[%s2394_s19 + $0x58] sm:$0xff] }
 0x5ae   : > { %1752 = vmatpush.msrb.mxu1 %v1745_v45 }
 0x5af   : > { %v1538_v49 = vmul.f32 %v2806_v50, %v2806_v50 }
 0x5b0   : > { %1753 = vmatpush.msrb.mxu1 %v1744_v47 }
 0x5b1   : > { %v1545_v51 = vsel %vm501_vm1, %v1538_v49, 0.0  ;;  %v1743_v49 = vld [vmem:[%s2394_s19 + $0x50] sm:$0xff] }
 0x5b2   : > { %1546 = vadd.xlane.f32.xlu0 %v1545_v51  ;;  %1754 = vmatpush.msrb.mxu1 %v1743_v49  ;;  %v1742_v51 = vld [vmem:[%s2394_s19 + $0x48] sm:$0xff] }
 0x5b4   : > { %1755 = vmatpush.msrb.mxu1 %v1742_v51 }
 0x5b6   : > { %1756 = vmatpush.msrb.mxu1 %v1741_v52 }
 0x5b8   : > { %1757 = vmatpush.msrb.mxu1 %v1740_v53 }
 0x5ba   : > { %1758 = vmatpush.msrb.mxu1 %v1739_v55 }
 0x5bc   : > { %1759 = vmatpush.msrb.mxu1 %v1738_v3 }
 0x5be   : > { %1760 = vmatpush.msrb.mxu1 %v1737_v57 }
 0x5c0   : > { %1761 = vmatpush.msrb.mxu1 %v1736_v58 }
 0x5c2   : > { %1762 = vmatpush.msrb.mxu1 %v1735_v10 }
 0x5c4   : > { %1763 = vmatpush.msrb.mxu1 %v1734_v60 }
 0x5c6   : > { %1764 = vmatpush.msrb.mxu1 %v1733_v63 }
 0x614   : > { %v1541_v8 = vpop.xlane.xlu1 %1540 }
 0x615   : > { %v1548_v30 = vmul.f32 %v1541_v8, %v2437_v37 }
 0x617   : > { %v1551_v17 = vadd.f32 1e-06, %v1548_v30 }
 0x619   : > { %2189 = vrsqrt.f32 %v1551_v17  ;;  %vm1560_vm13 = vweird.f32 %v1551_v17 }
 0x61d   : > { %v1544_v9 = vpop.xlane.xlu2 %1543 }
 0x61e   : > { %v1549_v2 = vmul.f32 %v1544_v9, %v2437_v37 }
 0x61f   : > { %v2190_v11 = vpop.eup %2189 }
 0x620   : > { %v1555_v12 = vmul.f32 %v2190_v11, %v1551_v17  ;;  %v1552_v15 = vadd.f32 1e-06, %v1549_v2  ;;  %vm1561_vm12 = vweird.f32 %v2190_v11 }
 0x621   : > { %vm1562_vm15 = vmor %vm1560_vm13, %vm1561_vm12 }
 0x622   : > { %v1556_v14 = vmul.f32 %v2190_v11, %v1555_v12  ;;  %2191 = vrsqrt.f32 %v1552_v15  ;;  %vm1570_vm2 = vweird.f32 %v1552_v15 }
 0x624   : > { %v1557_v16 = vmul.f32 0.5, %v1556_v14 }
 0x625   : > { %v1547_v18 = vpop.xlane.xlu0 %1546 }
 0x626   : > { %v1558_v32 = vsub.f32 1.5, %v1557_v16  ;;  %v1550_v19 = vmul.f32 %v1547_v18, %v2437_v37 }
 0x628   : > { %v2192_v4 = vpop.eup %2191  ;;  %v1559_v5 = vmul.f32 %v2190_v11, %v1558_v32  ;;  %v1553_v21 = vadd.f32 1e-06, %v1550_v19 }
 0x629   : > { %v1565_v20 = vmul.f32 %v2192_v4, %v1552_v15  ;;  %vm1571_vm0 = vweird.f32 %v2192_v4 }
 0x62a   : > { %v1563_v13 = vsel %vm1562_vm15, %v2190_v11, %v1559_v5  ;;  %2193 = vrsqrt.f32 %v1553_v21  ;;  %vm1572_vm3 = vmor %vm1570_vm2, %vm1571_vm0  ;;  %vm1580_vm5 = vweird.f32 %v1553_v21 }
 0x62b   : > { %v1584_v46 = vmul.f32 %v1563_v13, %v2796_v39  ;;  %v1566_v23 = vmul.f32 %v2192_v4, %v1565_v20 }
 0x62d   : > { %v1590_v24 = vmul.f32 %v2132_v7, %v1584_v46  ;;  %v1567_v25 = vmul.f32 0.5, %v1566_v23 }
 0x62f   : > { %v1568_v26 = vsub.f32 1.5, %v1567_v25  ;;  %2043 = vmatmul.msk.f32.vlgmr.msrb.gmra.mxu3 %vm501_vm1, %v1590_v24  ;;  %2046 = vmatmul.msk.f32.vlgmr.msrb.gmra.mxu0 %vm501_vm1, %v1590_v24 }
 0x630   : > { %v2194_v28 = vpop.eup %2193 }
 0x631   : > { %v1569_v29 = vmul.f32 %v2192_v4, %v1568_v26  ;;  %v1575_v31 = vmul.f32 %v2194_v28, %v1553_v21  ;;  %vm1581_vm4 = vweird.f32 %v2194_v28 }
 0x632   : > { %vm1582_vm6 = vmor %vm1580_vm5, %vm1581_vm4 }
 0x633   : > { %v1576_v54 = vmul.f32 %v2194_v28, %v1575_v31  ;;  %v1573_v33 = vsel %vm1572_vm3, %v2192_v4, %v1569_v29 }
 0x634   : > { %v1585_v35 = vmul.f32 %v1573_v33, %v2801_v43 }
 0x635   : > { %v1577_v36 = vmul.f32 0.5, %v1576_v54 }
 0x636   : > { %v1591_v38 = vmul.f32 %v2132_v7, %v1585_v35 }
 0x637   : > { %v1578_v56 = vsub.f32 1.5, %v1577_v36 }
 0x638   : > { %2044 = vmatmul.msk.f32.gmra.mxu3 %vm501_vm1, %v1591_v38  ;;  %2047 = vmatmul.msk.f32.gmra.mxu0 %vm501_vm1, %v1591_v38 }
 0x639   : > { %v1579_v34 = vmul.f32 %v2194_v28, %v1578_v56 }
 0x63b   : > { %v1583_v62 = vsel %vm1582_vm6, %v2194_v28, %v1579_v34 }
 0x63c   : > { %v1586_v41 = vmul.f32 %v1583_v62, %v2806_v50 }
 0x63e   : > { %v1592_v59 = vmul.f32 %v2132_v7, %v1586_v41 }
 0x640   : > { %2045 = vmatmul.msk.f32.gmra.mxu3 %vm501_vm1, %v1592_v59  ;;  %2048 = vmatmul.msk.f32.gmra.mxu0 %vm501_vm1, %v1592_v59 }
 0x6ac   : > { %v1661_v19 = vpop.f32.mrf.mxu0 }
 0x6b2   : > { %v1635_v48 = vpop.f32.mrf.mxu3 }
 0x6b3   : > { %v2049_v61 = vmul.f32 -1.442695, %v1635_v48 }
 0x6b5   : > { %2195 = vpow2.f32 %v2049_v61  ;;  %v1664_v33 = vpop.f32.mrf.mxu0 }
 0x6bb   : > { %v2196_v0 = vpop.eup %2195  ;;  %v1638_v27 = vpop.f32.mrf.mxu3 }
 0x6bc   : > { %v1679_v22 = vadd.f32 1.0, %v2196_v0  ;;  %v2050_v6 = vmul.f32 -1.442695, %v1638_v27 }
 0x6bd   : > { %v1667_v49 = vpop.f32.mrf.mxu0 }
 0x6be   : > { %2197 = vrcp.f32 %v1679_v22  ;;  %v1693_v12 = vand.u32 2147483648, %v1679_v22  ;;  %v1691_v14 = vand.u32 2147483647, %v1679_v22  ;;  %vm1687_vm8 = vweird.f32 %v1679_v22 }
 0x6bf   : > { %2199 = vpow2.f32 %v2050_v6 }
 0x6c0   : > { %v1694_v32 = vor.u32 1.1754944e-38, %v1693_v12  ;;  %vm1692_vm10 = vcmp.eq.f32.partialorder %v1691_v14, 8.507059e+37 }
 0x6c3   : > { %v1641_v1 = vpop.f32.mrf.mxu3 }
 0x6c4   : > { %v2198_v8 = vpop.eup %2197  ;;  %v2051_v30 = vmul.f32 -1.442695, %v1641_v1 }
 0x6c5   : > { %v2200_v17 = vpop.eup %2199  ;;  %v1683_v9 = vmul.f32 %v2198_v8, %v1679_v22  ;;  %vm1688_vm7 = vweird.f32 %v2198_v8 }
 0x6c6   : > { %v1680_v2 = vadd.f32 1.0, %v2200_v17  ;;  %2201 = vpow2.f32 %v2051_v30  ;;  %vm1689_vm9 = vmor %vm1687_vm8, %vm1688_vm7 }
 0x6c7   : > { %v1684_v11 = vsub.f32 1.0, %v1683_v9 }
 0x6c8   : > { %2203 = vrcp.f32 %v1680_v2  ;;  %v1708_v24 = vand.u32 2147483648, %v1680_v2  ;;  %v1706_v26 = vand.u32 2147483647, %v1680_v2  ;;  %vm1702_vm11 = vweird.f32 %v1680_v2 }
 0x6c9   : > { %v1685_v15 = vmul.f32 %v2198_v8, %v1684_v11 }
 0x6ca   : > { %v1709_v31 = vor.u32 1.1754944e-38, %v1708_v24  ;;  %vm1707_vm13 = vcmp.eq.f32.partialorder %v1706_v26, 8.507059e+37 }
 0x6cb   : > { %v1686_v16 = vadd.f32 %v2198_v8, %v1685_v15 }
 0x6cc   : > { %v2202_v18 = vpop.eup %2201 }
 0x6cd   : > { %v1690_v4 = vsel %vm1689_vm9, %v2198_v8, %v1686_v16  ;;  %v1681_v5 = vadd.f32 1.0, %v2202_v18 }
 0x6ce   : > { %v2204_v21 = vpop.eup %2203  ;;  %v1695_v7 = vsel %vm1692_vm10, %v1694_v32, %v1690_v4 }
 0x6cf   : > { %v1727_v20 = vmul.f32 %v1695_v7, %v1635_v48  ;;  %v1698_v13 = vmul.f32 %v2204_v21, %v1680_v2  ;;  %2205 = vrcp.f32 %v1681_v5  ;;  %vm1703_vm14 = vweird.f32 %v2204_v21 }
 0x6d0   : > { %vm1704_vm12 = vmor %vm1702_vm11, %vm1703_vm14  ;;  %v1723_v34 = vand.u32 2147483648, %v1681_v5  ;;  %v1721_v41 = vand.u32 2147483647, %v1681_v5  ;;  %vm1717_vm0 = vweird.f32 %v1681_v5 }
 0x6d1   : > { %v1730_v46 = vmul.f32 %v1727_v20, %v1661_v19  ;;  %v1699_v23 = vsub.f32 1.0, %v1698_v13 }
 0x6d2   : > { %v1724_v44 = vor.u32 1.1754944e-38, %v1723_v34  ;;  %vm1722_vm3 = vcmp.eq.f32.partialorder %v1721_v41, 8.507059e+37 }
 0x6d3   : > { %v1700_v25 = vmul.f32 %v2204_v21, %v1699_v23  ;;  %1765 = vmatmul.f32.vlgmr.msrb.gmra.mxu1 %v1730_v46 }
 0x6d5   : > { %v2206_v28 = vpop.eup %2205  ;;  %v1701_v29 = vadd.f32 %v2204_v21, %v1700_v25 }
 0x6d6   : > { %v1713_v54 = vmul.f32 %v2206_v28, %v1681_v5  ;;  %vm1718_vm15 = vweird.f32 %v2206_v28 }
 0x6d7   : > { %v1705_v35 = vsel %vm1704_vm12, %v2204_v21, %v1701_v29  ;;  %vm1719_vm2 = vmor %vm1717_vm0, %vm1718_vm15 }
 0x6d8   : > { %v1710_v36 = vsel %vm1707_vm13, %v1709_v31, %v1705_v35  ;;  %v1714_v38 = vsub.f32 1.0, %v1713_v54 }
 0x6d9   : > { %v1728_v56 = vmul.f32 %v1710_v36, %v1638_v27 }
 0x6da   : > { %v1715_v62 = vmul.f32 %v2206_v28, %v1714_v38 }
 0x6db   : > { %v1731_v59 = vmul.f32 %v1728_v56, %v1664_v33 }
 0x6dc   : > { %v1716_v42 = vadd.f32 %v2206_v28, %v1715_v62 }
 0x6dd   : > { %1768 = vmatmul.f32.gmra.mxu1 %v1731_v59 }
 0x6de   : > { %v1720_v40 = vsel %vm1719_vm2, %v2206_v28, %v1716_v42 }
 0x6df   : > { %v1725_v45 = vsel %vm1722_vm3, %v1724_v44, %v1720_v40 }
 0x6e0   : > { %v1729_v47 = vmul.f32 %v1725_v45, %v1641_v1 }
 0x6e2   : > { %v1732_v51 = vmul.f32 %v1729_v47, %v1667_v49 }
 0x6e5   : > { %1771 = vmatmul.f32.gmra.mxu1 %v1732_v51 }
 0x750   : > { %v1766_v52 = vpop.f32.mrf.mxu1 }
 0x751   : > { %v1775_v53 = vadd.f32 %v1766_v52, %v2796_v39 }
 0x753   : > { %1778 = vst.msk [vmem:[#allocation2] sm:$0xff] %vm501_vm1, %v1775_v53 }
 0x75a   : > { %v1769_v55 = vpop.f32.mrf.mxu1 }
 0x75b   : > { %v2863_v3 = vadd.f32 %v1769_v55, %v2801_v43 }
 0x75d   : > { %1779 = vst.msk [vmem:[#allocation2 + $0x8] sm:$0xff] %vm501_vm1, %v2863_v3 }
 0x761   : > { %1784 = sbr.rel (%p2052_p8) target bundleno = 2048 (0x800), region = 68 }
 0x762   : > { %v1772_v57 = vpop.f32.mrf.mxu1 }
 0x763   : > { %v1777_v58 = vadd.f32 %v1772_v57, %v2806_v50 }
 0x765   : > { %1780 = vst.msk [vmem:[#allocation2 + $0x10] sm:$0xff] %vm501_vm1, %v1777_v58 }
 0x766   : > { %v1788_v10 = vmul.f32 %v1777_v58, %v1777_v58  ;;  %v1786_v48 = vmul.f32 %v1775_v53, %v1775_v53  ;;  %v1787_v43 = vmul.f32 %v2863_v3, %v2863_v3 }
 0x768   : > { %v1795_v39 = vsel %vm501_vm1, %v1788_v10, 0.0  ;;  %v1789_v60 = vsel %vm501_vm1, %v1786_v48, 0.0  ;;  %v1792_v61 = vsel %vm501_vm1, %v1787_v43, 0.0 }
 0x769   : > { %1796 = vadd.xlane.f32.xlu1 %v1795_v39  ;;  %1790 = vadd.xlane.f32.xlu0 %v1789_v60 }
 0x771   : > { %1793 = vadd.xlane.f32.xlu0 %v1792_v61 }
 0x7dc   : > { %v1797_v50 = vpop.xlane.xlu1 %1796  ;;  %v1791_v63 = vpop.xlane.xlu0 %1790 }
 0x7dd   : > { %v1800_v0 = vmul.f32 %v1797_v50, %v2437_v37  ;;  %v1798_v27 = vmul.f32 %v1791_v63, %v2437_v37 }
 0x7df   : > { %v1803_v22 = vadd.f32 1e-06, %v1800_v0  ;;  %v1801_v6 = vadd.f32 1e-06, %v1798_v27 }
 0x7e1   : > { %2211 = vrsqrt.f32 %v1803_v22  ;;  %vm1810_vm5 = vweird.f32 %v1801_v6  ;;  %vm1830_vm7 = vweird.f32 %v1803_v22 }
 0x7e2   : > { %2213 = vrsqrt.f32 %v1801_v6 }
 0x7e4   : > { %v1794_v1 = vpop.xlane.xlu0 %1793 }
 0x7e5   : > { %v1799_v8 = vmul.f32 %v1794_v1, %v2437_v37  ;;  %v2210_v37 = vld [vmem:[%s2912_s9] ss:$0 sm:$0xff] }
 0x7e7   : > { %v2212_v30 = vpop.eup %2211  ;;  %v1802_v17 = vadd.f32 1e-06, %v1799_v8 }
 0x7e8   : > { %v2214_v9 = vpop.eup %2213  ;;  %v1825_v2 = vmul.f32 %v2212_v30, %v1803_v22  ;;  %vm1831_vm8 = vweird.f32 %v2212_v30 }
 0x7e9   : > { %v1805_v11 = vmul.f32 %v2214_v9, %v1801_v6  ;;  %2215 = vrsqrt.f32 %v1802_v17  ;;  %vm1811_vm4 = vweird.f32 %v2214_v9  ;;  %vm1832_vm9 = vmor %vm1830_vm7, %vm1831_vm8  ;;  %vm1820_vm14 = vweird.f32 %v1802_v17 }
 0x7ea   : > { %v1826_v12 = vmul.f32 %v2212_v30, %v1825_v2  ;;  %vm1812_vm6 = vmor %vm1810_vm5, %vm1811_vm4 }
 0x7eb   : > { %v1806_v15 = vmul.f32 %v2214_v9, %v1805_v11 }
 0x7ec   : > { %v1827_v14 = vmul.f32 0.5, %v1826_v12 }
 0x7ed   : > { %v1807_v16 = vmul.f32 0.5, %v1806_v15 }
 0x7ee   : > { %v1828_v32 = vsub.f32 1.5, %v1827_v14 }
 0x7ef   : > { %v2216_v18 = vpop.eup %2215  ;;  %v1808_v19 = vsub.f32 1.5, %v1807_v16 }
 0x7f0   : > { %v1815_v4 = vmul.f32 %v2216_v18, %v1802_v17  ;;  %v1829_v7 = vmul.f32 %v2212_v30, %v1828_v32  ;;  %vm1821_vm10 = vweird.f32 %v2216_v18 }
 0x7f1   : > { %v1809_v5 = vmul.f32 %v2214_v9, %v1808_v19  ;;  %vm1822_vm11 = vmor %vm1820_vm14, %vm1821_vm10 }
 0x7f2   : > { %v1816_v21 = vmul.f32 %v2216_v18, %v1815_v4  ;;  %v1833_v25 = vsel %vm1832_vm9, %v2212_v30, %v1829_v7 }
 0x7f3   : > { %v1813_v20 = vsel %vm1812_vm6, %v2214_v9, %v1809_v5  ;;  %v1836_v28 = vmul.f32 %v1833_v25, %v1777_v58 }
 0x7f4   : > { %v1834_v13 = vmul.f32 %v1813_v20, %v1775_v53  ;;  %v1817_v46 = vmul.f32 0.5, %v1816_v21 }
 0x7f5   : > { %v1842_v33 = vmul.f32 %v2210_v37, %v1836_v28 }
 0x7f6   : > { %v1840_v23 = vmul.f32 %v2210_v37, %v1834_v13  ;;  %v1818_v24 = vsub.f32 1.5, %v1817_v46 }
 0x7f7   : > { %1845 = vst.msk [vmem:[%s2384_s20 + $0x10] sm:$0xff] %vm501_vm1, %v1842_v33 }
 0x7f8   : > { %1843 = vst.msk [vmem:[%s2384_s20] sm:$0xff] %vm501_vm1, %v1840_v23  ;;  %v1819_v26 = vmul.f32 %v2216_v18, %v1818_v24 }
 0x7fa   : > { %v1823_v29 = vsel %vm1822_vm11, %v2216_v18, %v1819_v26 }
 0x7fb   : > { %v1835_v31 = vmul.f32 %v1823_v29, %v2863_v3 }
 0x7fd   : > { %v1841_v54 = vmul.f32 %v2210_v37, %v1835_v31 }
 0x7ff   : > { %1844 = vst.msk [vmem:[%s2384_s20 + $0x8] sm:$0xff] %vm501_vm1, %v1841_v54 }
 0x800 PF: > { %s2926_s19 = sld [smem:[#allocation5_spill]] }
 0x801   : > { %s2927_s13 = sld [smem:[#allocation3_spill]] }
 0x802   : > { %s2928_s14 = sld [smem:[#allocation4_spill]] }
 0x803   : > { %s2929_s15 = sld [smem:[#allocation6_spill]] }
 0x804   : > { %s2930_s16 = sld [smem:[#allocation7_spill]] }
 0x806   : > { %s20_s17 = sadd.s32 1, %s2926_s19  }
 0x807   : > { %p17_p9 = scmp.ge.s32.totalorder %s20_s17, 6  }
 0x809   :  { %19 = sbr.rel (!%p17_p9) target bundleno = 3 (0x3), region = 116 }

</bundles_post_ra>
